<compile_context>
chip_gen: v7x
topology: tpu7x:2x2x1
jax: 0.10.0
libtpu: 0.0.40
codegen_flags: <defaults>
</compile_context>

<pallas_src>
import functools

import jax
import jax.numpy as jnp
from jax import lax
from jax.experimental import pallas as pl
from jax.experimental.pallas import tpu as pltpu


def _tpu_budgets():
    """(vmem_limit_bytes, x_block_byte_budget) derived per TPU generation."""
    cap = None
    try:
        cap = getattr(pltpu.get_tpu_info(), "vmem_capacity_bytes", None)
    except Exception:
        cap = None
    if not cap:
        cap = 64 * 1024 * 1024                 # conservative default (v7x-sized VMEM)
    vmem_limit = int(cap * 3 // 4)             # headroom for compiler scratch/dbl-buffers
    block_budget = (4 << 20) if cap <= (64 << 20) else (6 << 20)
    return vmem_limit, block_budget


def _pick_batch_block(n, per_item_bytes, budget_bytes):
    """Largest divisor of n under the byte budget, preferring >=4 grid steps."""
    nb = max(1, min(n, budget_bytes // max(per_item_bytes, 1)))
    target_steps = 4 if n >= 4 else (2 if n >= 2 else 1)
    nb = min(nb, max(1, n // target_steps))
    while n % nb:
        nb -= 1
    return nb


def _masked_taps(conv_w, h, w):
    """Fold the 7x7 conv taps with the zero-padding validity masks.

    Returns (2*49, H*W) f32: row (c*49 + dh*7 + dw) holds, for every output
    position p = y*W + x, the tap conv_w[0, c, dh, dw] if neighbour
    (y+dh-3, x+dw-3) lies inside the image, else 0.  This turns the padded
    7x7 conv into 98 lane-dense roll + multiply-accumulate steps in-kernel.
    """
    pad = 3
    taps = conv_w.reshape(2, 7, 7).astype(jnp.float32)
    hi = jnp.arange(h)
    wi = jnp.arange(w)
    dh = jnp.arange(7) - pad
    dw = jnp.arange(7) - pad
    h_ok = (hi[None, :] + dh[:, None] >= 0) & (hi[None, :] + dh[:, None] < h)   # (7, H)
    w_ok = (wi[None, :] + dw[:, None] >= 0) & (wi[None, :] + dw[:, None] < w)   # (7, W)
    mask = (h_ok[:, None, :, None] & w_ok[None, :, None, :]).astype(jnp.float32)  # (7,7,H,W)
    wtap = taps[:, :, :, None, None] * mask[None]                                  # (2,7,7,H,W)
    return wtap.reshape(2 * 49, h * w)


def sa_fused_kernel(wtap_ref, x_ref, o_ref, *, width):
    """Fused SA: channel mean/max -> 7x7 conv -> sigmoid -> scale, one x pass.

    wtap_ref: (98, H*W) f32 padding-masked conv taps (lane dim = H*W)
    x_ref:    (nb, C, H*W) input block (lane dim = H*W, lane dense)
    o_ref:    (nb, C, H*W) output block
    """
    nb, _, hw = x_ref.shape

    # ---- channel pooling: single load + f32 cast, both stats derived from it.
    xv = x_ref[...].astype(jnp.float32)                    # (nb, C, HW)
    mean = jnp.mean(xv, axis=1)                            # (nb, HW)
    mx = jnp.max(xv, axis=1)                               # (nb, HW)

    # ---- 7x7 'same' conv (2 -> 1 channel, no bias), lane-dense roll + MAC.
    # out(p) = sum_k stat(p + d_k) * tap_k; out-of-image neighbours (the zero
    # padding) are killed by the masks folded into wtap.  pltpu.roll matches
    # jnp.roll, so shift = -d_k brings stat(p + d_k) to position p.
    acc = jnp.zeros((nb, hw), jnp.float32)
    for k in range(49):
        dh, dw = divmod(k, 7)
        d = (dh - 3) * width + (dw - 3)
        shift = (-d) % hw
        r_mean = mean if shift == 0 else pltpu.roll(mean, shift, axis=1)
        r_max = mx if shift == 0 else pltpu.roll(mx, shift, axis=1)
        acc = acc + r_mean * wtap_ref[k:k + 1, :] \
                  + r_max * wtap_ref[49 + k:50 + k, :]

    att = jax.nn.sigmoid(acc).astype(o_ref.dtype)          # (nb, HW)

    # ---- scale: out = x * att broadcast over channels, in x's dtype.
    o_ref[...] = x_ref[...] * att[:, None, :]


@jax.jit
def sa_forward(x, conv_w):
    """SA.forward.  x: (N, C, H, W); conv_w: (1, 2, 7, 7) Conv2d weight (no bias)."""
    n, c, h, w = x.shape
    hw = h * w
    xf = x.reshape(n, c, hw)                    # lane dim = H*W (lane dense; fastest
                                                # when H*W is a multiple of 128)
    wtap = _masked_taps(conv_w, h, w)           # (98, HW) f32, tiny, computed in XLA

    vmem_limit, block_budget = _tpu_budgets()
    nb = _pick_batch_block(n, c * hw * x.dtype.itemsize, block_budget)
    nblk = n // nb
    # TODO(synk): if a single image's C*H*W slab exceeds the block budget
    # (nb == 1 and still too large for v7x's 64 MiB VMEM), fall back to a
    # two-pass C-tiled variant; not needed for the shapes exercised here.

    kernel = functools.partial(sa_fused_kernel, width=w)
    out = pl.pallas_call(
        kernel,
        out_shape=jax.ShapeDtypeStruct((n, c, hw), x.dtype),
        grid=(nblk,),
        in_specs=[
            pl.BlockSpec((2 * 49, hw), lambda i: (0, 0)),    # masked taps (constant block)
            pl.BlockSpec((nb, c, hw), lambda i: (i, 0, 0)),  # x block
        ],
        out_specs=pl.BlockSpec((nb, c, hw), lambda i: (i, 0, 0)),
        compiler_params=pltpu.CompilerParams(
            dimension_semantics=("parallel",),
            vmem_limit_bytes=vmem_limit,
        ),
    )(wtap, xf)
    return out.reshape(n, c, h, w)


def sa_reference(x, conv_w):
    """Pure-JAX reference matching the PyTorch SA module semantics."""
    avg = jnp.mean(x, axis=1, keepdims=True)
    mx = jnp.max(x, axis=1, keepdims=True)
    cat = jnp.concatenate([avg, mx], axis=1)                 # (N, 2, H, W)
    att = lax.conv_general_dilated(
        cat, conv_w, window_strides=(1, 1), padding=((3, 3), (3, 3)),
        dimension_numbers=("NCHW", "OIHW", "NCHW"),
        precision=lax.Precision.HIGHEST)
    return jax.nn.sigmoid(att) * x


if __name__ == "__main__":
    n, c, h, w = 2, 8, 16, 16
    key = jax.random.PRNGKey(0)
    kx, kw = jax.random.split(key)

    x = jax.random.normal(kx, (n, c, h, w), dtype=jnp.float32)
    # SpatialAttention conv1 weight: Conv2d(2, 1, 7, padding=3, bias=False) -> (1, 2, 7, 7)
    conv_w = jax.random.normal(kw, (1, 2, 7, 7), dtype=jnp.float32) * 0.1

    out = jax.block_until_ready(sa_forward(x, conv_w))
    ref = sa_reference(x, conv_w)

    assert out.shape == (n, c, h, w)
    assert jnp.allclose(out, ref, atol=1e-5, rtol=1e-5), "mismatch vs reference"
    print("KERNEL_OK")
</pallas_src>

<mosaic_0001>
module attributes {stable_mosaic.version = 11 : i64} {
  func.func @sa_fused_kernel(%arg0: i32, %arg1: memref<98x256xf32, #tpu.memory_space<vmem>>, %arg2: memref<1x8x256xf32, #tpu.memory_space<vmem>>, %arg3: memref<1x8x256xf32, #tpu.memory_space<vmem>>) attributes {dimension_semantics = [#tpu.dimension_semantics<parallel>], iteration_bounds = array<i64: 2>, scalar_prefetch = 0 : i64, scratch_operands = 0 : i64, tpu.core_type = #tpu.core_type<tc>, window_params = [{pipeline_mode = #tpu.pipeline_mode<synchronous>, transform_indices = @transform_0, window_bounds = array<i64: 98, 256>}, {transform_indices = @transform_1, window_bounds = array<i64: 1, 8, 256>}, {transform_indices = @transform_2, window_bounds = array<i64: 1, 8, 256>}]} {
    %c0 = arith.constant 0 : index
    %c0_0 = arith.constant 0 : index
    %c0_1 = arith.constant 0 : index
    %0 = vector.load %arg2[%c0, %c0_0, %c0_1] : memref<1x8x256xf32, #tpu.memory_space<vmem>>, vector<1x8x256xf32>
    %cst = arith.constant dense<0.000000e+00> : vector<1x256xf32>
    %1 = vector.multi_reduction <add>, %0, %cst [1] : vector<1x8x256xf32> to vector<1x256xf32>
    %cst_2 = arith.constant 8.000000e+00 : f32
    %2 = vector.broadcast %cst_2 : f32 to vector<1x256xf32>
    %3 = arith.divf %1, %2 : vector<1x256xf32>
    %cst_3 = arith.constant dense<0xFF800000> : vector<1x256xf32>
    %4 = vector.multi_reduction <maximumf>, %0, %cst_3 [1] : vector<1x8x256xf32> to vector<1x256xf32>
    %cst_4 = arith.constant 0.000000e+00 : f32
    %5 = vector.broadcast %cst_4 : f32 to vector<1x256xf32>
    %c51_i32 = arith.constant 51 : i32
    %6 = tpu.dynamic_rotate %3 by %c51_i32 dim 1 : vector<1x256xf32>, i32 -> vector<1x256xf32>
    %c51_i32_5 = arith.constant 51 : i32
    %7 = tpu.dynamic_rotate %4 by %c51_i32_5 dim 1 : vector<1x256xf32>, i32 -> vector<1x256xf32>
    %c0_6 = arith.constant 0 : index
    %c0_7 = arith.constant 0 : index
    %8 = vector.load %arg1[%c0_6, %c0_7] : memref<98x256xf32, #tpu.memory_space<vmem>>, vector<1x256xf32>
    %9 = arith.mulf %6, %8 : vector<1x256xf32>
    %10 = arith.addf %5, %9 : vector<1x256xf32>
    %c49 = arith.constant 49 : index
    %c0_8 = arith.constant 0 : index
    %11 = vector.load %arg1[%c49, %c0_8] : memref<98x256xf32, #tpu.memory_space<vmem>>, vector<1x256xf32>
    %12 = arith.mulf %7, %11 : vector<1x256xf32>
    %13 = arith.addf %10, %12 : vector<1x256xf32>
    %c50_i32 = arith.constant 50 : i32
    %14 = tpu.dynamic_rotate %3 by %c50_i32 dim 1 : vector<1x256xf32>, i32 -> vector<1x256xf32>
    %c50_i32_9 = arith.constant 50 : i32
    %15 = tpu.dynamic_rotate %4 by %c50_i32_9 dim 1 : vector<1x256xf32>, i32 -> vector<1x256xf32>
    %c1 = arith.constant 1 : index
    %c0_10 = arith.constant 0 : index
    %16 = vector.load %arg1[%c1, %c0_10] : memref<98x256xf32, #tpu.memory_space<vmem>>, vector<1x256xf32>
    %17 = arith.mulf %14, %16 : vector<1x256xf32>
    %18 = arith.addf %13, %17 : vector<1x256xf32>
    %c50 = arith.constant 50 : index
    %c0_11 = arith.constant 0 : index
    %19 = vector.load %arg1[%c50, %c0_11] : memref<98x256xf32, #tpu.memory_space<vmem>>, vector<1x256xf32>
    %20 = arith.mulf %15, %19 : vector<1x256xf32>
    %21 = arith.addf %18, %20 : vector<1x256xf32>
    %c49_i32 = arith.constant 49 : i32
    %22 = tpu.dynamic_rotate %3 by %c49_i32 dim 1 : vector<1x256xf32>, i32 -> vector<1x256xf32>
    %c49_i32_12 = arith.constant 49 : i32
    %23 = tpu.dynamic_rotate %4 by %c49_i32_12 dim 1 : vector<1x256xf32>, i32 -> vector<1x256xf32>
    %c2 = arith.constant 2 : index
    %c0_13 = arith.constant 0 : index
    %24 = vector.load %arg1[%c2, %c0_13] : memref<98x256xf32, #tpu.memory_space<vmem>>, vector<1x256xf32>
    %25 = arith.mulf %22, %24 : vector<1x256xf32>
    %26 = arith.addf %21, %25 : vector<1x256xf32>
    %c51 = arith.constant 51 : index
    %c0_14 = arith.constant 0 : index
    %27 = vector.load %arg1[%c51, %c0_14] : memref<98x256xf32, #tpu.memory_space<vmem>>, vector<1x256xf32>
    %28 = arith.mulf %23, %27 : vector<1x256xf32>
    %29 = arith.addf %26, %28 : vector<1x256xf32>
    %c48_i32 = arith.constant 48 : i32
    %30 = tpu.dynamic_rotate %3 by %c48_i32 dim 1 : vector<1x256xf32>, i32 -> vector<1x256xf32>
    %c48_i32_15 = arith.constant 48 : i32
    %31 = tpu.dynamic_rotate %4 by %c48_i32_15 dim 1 : vector<1x256xf32>, i32 -> vector<1x256xf32>
    %c3 = arith.constant 3 : index
    %c0_16 = arith.constant 0 : index
    %32 = vector.load %arg1[%c3, %c0_16] : memref<98x256xf32, #tpu.memory_space<vmem>>, vector<1x256xf32>
    %33 = arith.mulf %30, %32 : vector<1x256xf32>
    %34 = arith.addf %29, %33 : vector<1x256xf32>
    %c52 = arith.constant 52 : index
    %c0_17 = arith.constant 0 : index
    %35 = vector.load %arg1[%c52, %c0_17] : memref<98x256xf32, #tpu.memory_space<vmem>>, vector<1x256xf32>
    %36 = arith.mulf %31, %35 : vector<1x256xf32>
    %37 = arith.addf %34, %36 : vector<1x256xf32>
    %c47_i32 = arith.constant 47 : i32
    %38 = tpu.dynamic_rotate %3 by %c47_i32 dim 1 : vector<1x256xf32>, i32 -> vector<1x256xf32>
    %c47_i32_18 = arith.constant 47 : i32
    %39 = tpu.dynamic_rotate %4 by %c47_i32_18 dim 1 : vector<1x256xf32>, i32 -> vector<1x256xf32>
    %c4 = arith.constant 4 : index
    %c0_19 = arith.constant 0 : index
    %40 = vector.load %arg1[%c4, %c0_19] : memref<98x256xf32, #tpu.memory_space<vmem>>, vector<1x256xf32>
    %41 = arith.mulf %38, %40 : vector<1x256xf32>
    %42 = arith.addf %37, %41 : vector<1x256xf32>
    %c53 = arith.constant 53 : index
    %c0_20 = arith.constant 0 : index
    %43 = vector.load %arg1[%c53, %c0_20] : memref<98x256xf32, #tpu.memory_space<vmem>>, vector<1x256xf32>
    %44 = arith.mulf %39, %43 : vector<1x256xf32>
    %45 = arith.addf %42, %44 : vector<1x256xf32>
    %c46_i32 = arith.constant 46 : i32
    %46 = tpu.dynamic_rotate %3 by %c46_i32 dim 1 : vector<1x256xf32>, i32 -> vector<1x256xf32>
    %c46_i32_21 = arith.constant 46 : i32
    %47 = tpu.dynamic_rotate %4 by %c46_i32_21 dim 1 : vector<1x256xf32>, i32 -> vector<1x256xf32>
    %c5 = arith.constant 5 : index
    %c0_22 = arith.constant 0 : index
    %48 = vector.load %arg1[%c5, %c0_22] : memref<98x256xf32, #tpu.memory_space<vmem>>, vector<1x256xf32>
    %49 = arith.mulf %46, %48 : vector<1x256xf32>
    %50 = arith.addf %45, %49 : vector<1x256xf32>
    %c54 = arith.constant 54 : index
    %c0_23 = arith.constant 0 : index
    %51 = vector.load %arg1[%c54, %c0_23] : memref<98x256xf32, #tpu.memory_space<vmem>>, vector<1x256xf32>
    %52 = arith.mulf %47, %51 : vector<1x256xf32>
    %53 = arith.addf %50, %52 : vector<1x256xf32>
    %c45_i32 = arith.constant 45 : i32
    %54 = tpu.dynamic_rotate %3 by %c45_i32 dim 1 : vector<1x256xf32>, i32 -> vector<1x256xf32>
    %c45_i32_24 = arith.constant 45 : i32
    %55 = tpu.dynamic_rotate %4 by %c45_i32_24 dim 1 : vector<1x256xf32>, i32 -> vector<1x256xf32>
    %c6 = arith.constant 6 : index
    %c0_25 = arith.constant 0 : index
    %56 = vector.load %arg1[%c6, %c0_25] : memref<98x256xf32, #tpu.memory_space<vmem>>, vector<1x256xf32>
    %57 = arith.mulf %54, %56 : vector<1x256xf32>
    %58 = arith.addf %53, %57 : vector<1x256xf32>
    %c55 = arith.constant 55 : index
    %c0_26 = arith.constant 0 : index
    %59 = vector.load %arg1[%c55, %c0_26] : memref<98x256xf32, #tpu.memory_space<vmem>>, vector<1x256xf32>
    %60 = arith.mulf %55, %59 : vector<1x256xf32>
    %61 = arith.addf %58, %60 : vector<1x256xf32>
    %c35_i32 = arith.constant 35 : i32
    %62 = tpu.dynamic_rotate %3 by %c35_i32 dim 1 : vector<1x256xf32>, i32 -> vector<1x256xf32>
    %c35_i32_27 = arith.constant 35 : i32
    %63 = tpu.dynamic_rotate %4 by %c35_i32_27 dim 1 : vector<1x256xf32>, i32 -> vector<1x256xf32>
    %c7 = arith.constant 7 : index
    %c0_28 = arith.constant 0 : index
    %64 = vector.load %arg1[%c7, %c0_28] : memref<98x256xf32, #tpu.memory_space<vmem>>, vector<1x256xf32>
    %65 = arith.mulf %62, %64 : vector<1x256xf32>
    %66 = arith.addf %61, %65 : vector<1x256xf32>
    %c56 = arith.constant 56 : index
    %c0_29 = arith.constant 0 : index
    %67 = vector.load %arg1[%c56, %c0_29] : memref<98x256xf32, #tpu.memory_space<vmem>>, vector<1x256xf32>
    %68 = arith.mulf %63, %67 : vector<1x256xf32>
    %69 = arith.addf %66, %68 : vector<1x256xf32>
    %c34_i32 = arith.constant 34 : i32
    %70 = tpu.dynamic_rotate %3 by %c34_i32 dim 1 : vector<1x256xf32>, i32 -> vector<1x256xf32>
    %c34_i32_30 = arith.constant 34 : i32
    %71 = tpu.dynamic_rotate %4 by %c34_i32_30 dim 1 : vector<1x256xf32>, i32 -> vector<1x256xf32>
    %c8 = arith.constant 8 : index
    %c0_31 = arith.constant 0 : index
    %72 = vector.load %arg1[%c8, %c0_31] : memref<98x256xf32, #tpu.memory_space<vmem>>, vector<1x256xf32>
    %73 = arith.mulf %70, %72 : vector<1x256xf32>
    %74 = arith.addf %69, %73 : vector<1x256xf32>
    %c57 = arith.constant 57 : index
    %c0_32 = arith.constant 0 : index
    %75 = vector.load %arg1[%c57, %c0_32] : memref<98x256xf32, #tpu.memory_space<vmem>>, vector<1x256xf32>
    %76 = arith.mulf %71, %75 : vector<1x256xf32>
    %77 = arith.addf %74, %76 : vector<1x256xf32>
    %c33_i32 = arith.constant 33 : i32
    %78 = tpu.dynamic_rotate %3 by %c33_i32 dim 1 : vector<1x256xf32>, i32 -> vector<1x256xf32>
    %c33_i32_33 = arith.constant 33 : i32
    %79 = tpu.dynamic_rotate %4 by %c33_i32_33 dim 1 : vector<1x256xf32>, i32 -> vector<1x256xf32>
    %c9 = arith.constant 9 : index
    %c0_34 = arith.constant 0 : index
    %80 = vector.load %arg1[%c9, %c0_34] : memref<98x256xf32, #tpu.memory_space<vmem>>, vector<1x256xf32>
    %81 = arith.mulf %78, %80 : vector<1x256xf32>
    %82 = arith.addf %77, %81 : vector<1x256xf32>
    %c58 = arith.constant 58 : index
    %c0_35 = arith.constant 0 : index
    %83 = vector.load %arg1[%c58, %c0_35] : memref<98x256xf32, #tpu.memory_space<vmem>>, vector<1x256xf32>
    %84 = arith.mulf %79, %83 : vector<1x256xf32>
    %85 = arith.addf %82, %84 : vector<1x256xf32>
    %c32_i32 = arith.constant 32 : i32
    %86 = tpu.dynamic_rotate %3 by %c32_i32 dim 1 : vector<1x256xf32>, i32 -> vector<1x256xf32>
    %c32_i32_36 = arith.constant 32 : i32
    %87 = tpu.dynamic_rotate %4 by %c32_i32_36 dim 1 : vector<1x256xf32>, i32 -> vector<1x256xf32>
    %c10 = arith.constant 10 : index
    %c0_37 = arith.constant 0 : index
    %88 = vector.load %arg1[%c10, %c0_37] : memref<98x256xf32, #tpu.memory_space<vmem>>, vector<1x256xf32>
    %89 = arith.mulf %86, %88 : vector<1x256xf32>
    %90 = arith.addf %85, %89 : vector<1x256xf32>
    %c59 = arith.constant 59 : index
    %c0_38 = arith.constant 0 : index
    %91 = vector.load %arg1[%c59, %c0_38] : memref<98x256xf32, #tpu.memory_space<vmem>>, vector<1x256xf32>
    %92 = arith.mulf %87, %91 : vector<1x256xf32>
    %93 = arith.addf %90, %92 : vector<1x256xf32>
    %c31_i32 = arith.constant 31 : i32
    %94 = tpu.dynamic_rotate %3 by %c31_i32 dim 1 : vector<1x256xf32>, i32 -> vector<1x256xf32>
    %c31_i32_39 = arith.constant 31 : i32
    %95 = tpu.dynamic_rotate %4 by %c31_i32_39 dim 1 : vector<1x256xf32>, i32 -> vector<1x256xf32>
    %c11 = arith.constant 11 : index
    %c0_40 = arith.constant 0 : index
    %96 = vector.load %arg1[%c11, %c0_40] : memref<98x256xf32, #tpu.memory_space<vmem>>, vector<1x256xf32>
    %97 = arith.mulf %94, %96 : vector<1x256xf32>
    %98 = arith.addf %93, %97 : vector<1x256xf32>
    %c60 = arith.constant 60 : index
    %c0_41 = arith.constant 0 : index
    %99 = vector.load %arg1[%c60, %c0_41] : memref<98x256xf32, #tpu.memory_space<vmem>>, vector<1x256xf32>
    %100 = arith.mulf %95, %99 : vector<1x256xf32>
    %101 = arith.addf %98, %100 : vector<1x256xf32>
    %c30_i32 = arith.constant 30 : i32
    %102 = tpu.dynamic_rotate %3 by %c30_i32 dim 1 : vector<1x256xf32>, i32 -> vector<1x256xf32>
    %c30_i32_42 = arith.constant 30 : i32
    %103 = tpu.dynamic_rotate %4 by %c30_i32_42 dim 1 : vector<1x256xf32>, i32 -> vector<1x256xf32>
    %c12 = arith.constant 12 : index
    %c0_43 = arith.constant 0 : index
    %104 = vector.load %arg1[%c12, %c0_43] : memref<98x256xf32, #tpu.memory_space<vmem>>, vector<1x256xf32>
    %105 = arith.mulf %102, %104 : vector<1x256xf32>
    %106 = arith.addf %101, %105 : vector<1x256xf32>
    %c61 = arith.constant 61 : index
    %c0_44 = arith.constant 0 : index
    %107 = vector.load %arg1[%c61, %c0_44] : memref<98x256xf32, #tpu.memory_space<vmem>>, vector<1x256xf32>
    %108 = arith.mulf %103, %107 : vector<1x256xf32>
    %109 = arith.addf %106, %108 : vector<1x256xf32>
    %c29_i32 = arith.constant 29 : i32
    %110 = tpu.dynamic_rotate %3 by %c29_i32 dim 1 : vector<1x256xf32>, i32 -> vector<1x256xf32>
    %c29_i32_45 = arith.constant 29 : i32
    %111 = tpu.dynamic_rotate %4 by %c29_i32_45 dim 1 : vector<1x256xf32>, i32 -> vector<1x256xf32>
    %c13 = arith.constant 13 : index
    %c0_46 = arith.constant 0 : index
    %112 = vector.load %arg1[%c13, %c0_46] : memref<98x256xf32, #tpu.memory_space<vmem>>, vector<1x256xf32>
    %113 = arith.mulf %110, %112 : vector<1x256xf32>
    %114 = arith.addf %109, %113 : vector<1x256xf32>
    %c62 = arith.constant 62 : index
    %c0_47 = arith.constant 0 : index
    %115 = vector.load %arg1[%c62, %c0_47] : memref<98x256xf32, #tpu.memory_space<vmem>>, vector<1x256xf32>
    %116 = arith.mulf %111, %115 : vector<1x256xf32>
    %117 = arith.addf %114, %116 : vector<1x256xf32>
    %c19_i32 = arith.constant 19 : i32
    %118 = tpu.dynamic_rotate %3 by %c19_i32 dim 1 : vector<1x256xf32>, i32 -> vector<1x256xf32>
    %c19_i32_48 = arith.constant 19 : i32
    %119 = tpu.dynamic_rotate %4 by %c19_i32_48 dim 1 : vector<1x256xf32>, i32 -> vector<1x256xf32>
    %c14 = arith.constant 14 : index
    %c0_49 = arith.constant 0 : index
    %120 = vector.load %arg1[%c14, %c0_49] : memref<98x256xf32, #tpu.memory_space<vmem>>, vector<1x256xf32>
    %121 = arith.mulf %118, %120 : vector<1x256xf32>
    %122 = arith.addf %117, %121 : vector<1x256xf32>
    %c63 = arith.constant 63 : index
    %c0_50 = arith.constant 0 : index
    %123 = vector.load %arg1[%c63, %c0_50] : memref<98x256xf32, #tpu.memory_space<vmem>>, vector<1x256xf32>
    %124 = arith.mulf %119, %123 : vector<1x256xf32>
    %125 = arith.addf %122, %124 : vector<1x256xf32>
    %c18_i32 = arith.constant 18 : i32
    %126 = tpu.dynamic_rotate %3 by %c18_i32 dim 1 : vector<1x256xf32>, i32 -> vector<1x256xf32>
    %c18_i32_51 = arith.constant 18 : i32
    %127 = tpu.dynamic_rotate %4 by %c18_i32_51 dim 1 : vector<1x256xf32>, i32 -> vector<1x256xf32>
    %c15 = arith.constant 15 : index
    %c0_52 = arith.constant 0 : index
    %128 = vector.load %arg1[%c15, %c0_52] : memref<98x256xf32, #tpu.memory_space<vmem>>, vector<1x256xf32>
    %129 = arith.mulf %126, %128 : vector<1x256xf32>
    %130 = arith.addf %125, %129 : vector<1x256xf32>
    %c64 = arith.constant 64 : index
    %c0_53 = arith.constant 0 : index
    %131 = vector.load %arg1[%c64, %c0_53] : memref<98x256xf32, #tpu.memory_space<vmem>>, vector<1x256xf32>
    %132 = arith.mulf %127, %131 : vector<1x256xf32>
    %133 = arith.addf %130, %132 : vector<1x256xf32>
    %c17_i32 = arith.constant 17 : i32
    %134 = tpu.dynamic_rotate %3 by %c17_i32 dim 1 : vector<1x256xf32>, i32 -> vector<1x256xf32>
    %c17_i32_54 = arith.constant 17 : i32
    %135 = tpu.dynamic_rotate %4 by %c17_i32_54 dim 1 : vector<1x256xf32>, i32 -> vector<1x256xf32>
    %c16 = arith.constant 16 : index
    %c0_55 = arith.constant 0 : index
    %136 = vector.load %arg1[%c16, %c0_55] : memref<98x256xf32, #tpu.memory_space<vmem>>, vector<1x256xf32>
    %137 = arith.mulf %134, %136 : vector<1x256xf32>
    %138 = arith.addf %133, %137 : vector<1x256xf32>
    %c65 = arith.constant 65 : index
    %c0_56 = arith.constant 0 : index
    %139 = vector.load %arg1[%c65, %c0_56] : memref<98x256xf32, #tpu.memory_space<vmem>>, vector<1x256xf32>
    %140 = arith.mulf %135, %139 : vector<1x256xf32>
    %141 = arith.addf %138, %140 : vector<1x256xf32>
    %c16_i32 = arith.constant 16 : i32
    %142 = tpu.dynamic_rotate %3 by %c16_i32 dim 1 : vector<1x256xf32>, i32 -> vector<1x256xf32>
    %c16_i32_57 = arith.constant 16 : i32
    %143 = tpu.dynamic_rotate %4 by %c16_i32_57 dim 1 : vector<1x256xf32>, i32 -> vector<1x256xf32>
    %c17 = arith.constant 17 : index
    %c0_58 = arith.constant 0 : index
    %144 = vector.load %arg1[%c17, %c0_58] : memref<98x256xf32, #tpu.memory_space<vmem>>, vector<1x256xf32>
    %145 = arith.mulf %142, %144 : vector<1x256xf32>
    %146 = arith.addf %141, %145 : vector<1x256xf32>
    %c66 = arith.constant 66 : index
    %c0_59 = arith.constant 0 : index
    %147 = vector.load %arg1[%c66, %c0_59] : memref<98x256xf32, #tpu.memory_space<vmem>>, vector<1x256xf32>
    %148 = arith.mulf %143, %147 : vector<1x256xf32>
    %149 = arith.addf %146, %148 : vector<1x256xf32>
    %c15_i32 = arith.constant 15 : i32
    %150 = tpu.dynamic_rotate %3 by %c15_i32 dim 1 : vector<1x256xf32>, i32 -> vector<1x256xf32>
    %c15_i32_60 = arith.constant 15 : i32
    %151 = tpu.dynamic_rotate %4 by %c15_i32_60 dim 1 : vector<1x256xf32>, i32 -> vector<1x256xf32>
    %c18 = arith.constant 18 : index
    %c0_61 = arith.constant 0 : index
    %152 = vector.load %arg1[%c18, %c0_61] : memref<98x256xf32, #tpu.memory_space<vmem>>, vector<1x256xf32>
    %153 = arith.mulf %150, %152 : vector<1x256xf32>
    %154 = arith.addf %149, %153 : vector<1x256xf32>
    %c67 = arith.constant 67 : index
    %c0_62 = arith.constant 0 : index
    %155 = vector.load %arg1[%c67, %c0_62] : memref<98x256xf32, #tpu.memory_space<vmem>>, vector<1x256xf32>
    %156 = arith.mulf %151, %155 : vector<1x256xf32>
    %157 = arith.addf %154, %156 : vector<1x256xf32>
    %c14_i32 = arith.constant 14 : i32
    %158 = tpu.dynamic_rotate %3 by %c14_i32 dim 1 : vector<1x256xf32>, i32 -> vector<1x256xf32>
    %c14_i32_63 = arith.constant 14 : i32
    %159 = tpu.dynamic_rotate %4 by %c14_i32_63 dim 1 : vector<1x256xf32>, i32 -> vector<1x256xf32>
    %c19 = arith.constant 19 : index
    %c0_64 = arith.constant 0 : index
    %160 = vector.load %arg1[%c19, %c0_64] : memref<98x256xf32, #tpu.memory_space<vmem>>, vector<1x256xf32>
    %161 = arith.mulf %158, %160 : vector<1x256xf32>
    %162 = arith.addf %157, %161 : vector<1x256xf32>
    %c68 = arith.constant 68 : index
    %c0_65 = arith.constant 0 : index
    %163 = vector.load %arg1[%c68, %c0_65] : memref<98x256xf32, #tpu.memory_space<vmem>>, vector<1x256xf32>
    %164 = arith.mulf %159, %163 : vector<1x256xf32>
    %165 = arith.addf %162, %164 : vector<1x256xf32>
    %c13_i32 = arith.constant 13 : i32
    %166 = tpu.dynamic_rotate %3 by %c13_i32 dim 1 : vector<1x256xf32>, i32 -> vector<1x256xf32>
    %c13_i32_66 = arith.constant 13 : i32
    %167 = tpu.dynamic_rotate %4 by %c13_i32_66 dim 1 : vector<1x256xf32>, i32 -> vector<1x256xf32>
    %c20 = arith.constant 20 : index
    %c0_67 = arith.constant 0 : index
    %168 = vector.load %arg1[%c20, %c0_67] : memref<98x256xf32, #tpu.memory_space<vmem>>, vector<1x256xf32>
    %169 = arith.mulf %166, %168 : vector<1x256xf32>
    %170 = arith.addf %165, %169 : vector<1x256xf32>
    %c69 = arith.constant 69 : index
    %c0_68 = arith.constant 0 : index
    %171 = vector.load %arg1[%c69, %c0_68] : memref<98x256xf32, #tpu.memory_space<vmem>>, vector<1x256xf32>
    %172 = arith.mulf %167, %171 : vector<1x256xf32>
    %173 = arith.addf %170, %172 : vector<1x256xf32>
    %c3_i32 = arith.constant 3 : i32
    %174 = tpu.dynamic_rotate %3 by %c3_i32 dim 1 : vector<1x256xf32>, i32 -> vector<1x256xf32>
    %c3_i32_69 = arith.constant 3 : i32
    %175 = tpu.dynamic_rotate %4 by %c3_i32_69 dim 1 : vector<1x256xf32>, i32 -> vector<1x256xf32>
    %c21 = arith.constant 21 : index
    %c0_70 = arith.constant 0 : index
    %176 = vector.load %arg1[%c21, %c0_70] : memref<98x256xf32, #tpu.memory_space<vmem>>, vector<1x256xf32>
    %177 = arith.mulf %174, %176 : vector<1x256xf32>
    %178 = arith.addf %173, %177 : vector<1x256xf32>
    %c70 = arith.constant 70 : index
    %c0_71 = arith.constant 0 : index
    %179 = vector.load %arg1[%c70, %c0_71] : memref<98x256xf32, #tpu.memory_space<vmem>>, vector<1x256xf32>
    %180 = arith.mulf %175, %179 : vector<1x256xf32>
    %181 = arith.addf %178, %180 : vector<1x256xf32>
    %c2_i32 = arith.constant 2 : i32
    %182 = tpu.dynamic_rotate %3 by %c2_i32 dim 1 : vector<1x256xf32>, i32 -> vector<1x256xf32>
    %c2_i32_72 = arith.constant 2 : i32
    %183 = tpu.dynamic_rotate %4 by %c2_i32_72 dim 1 : vector<1x256xf32>, i32 -> vector<1x256xf32>
    %c22 = arith.constant 22 : index
    %c0_73 = arith.constant 0 : index
    %184 = vector.load %arg1[%c22, %c0_73] : memref<98x256xf32, #tpu.memory_space<vmem>>, vector<1x256xf32>
    %185 = arith.mulf %182, %184 : vector<1x256xf32>
    %186 = arith.addf %181, %185 : vector<1x256xf32>
    %c71 = arith.constant 71 : index
    %c0_74 = arith.constant 0 : index
    %187 = vector.load %arg1[%c71, %c0_74] : memref<98x256xf32, #tpu.memory_space<vmem>>, vector<1x256xf32>
    %188 = arith.mulf %183, %187 : vector<1x256xf32>
    %189 = arith.addf %186, %188 : vector<1x256xf32>
    %c1_i32 = arith.constant 1 : i32
    %190 = tpu.dynamic_rotate %3 by %c1_i32 dim 1 : vector<1x256xf32>, i32 -> vector<1x256xf32>
    %c1_i32_75 = arith.constant 1 : i32
    %191 = tpu.dynamic_rotate %4 by %c1_i32_75 dim 1 : vector<1x256xf32>, i32 -> vector<1x256xf32>
    %c23 = arith.constant 23 : index
    %c0_76 = arith.constant 0 : index
    %192 = vector.load %arg1[%c23, %c0_76] : memref<98x256xf32, #tpu.memory_space<vmem>>, vector<1x256xf32>
    %193 = arith.mulf %190, %192 : vector<1x256xf32>
    %194 = arith.addf %189, %193 : vector<1x256xf32>
    %c72 = arith.constant 72 : index
    %c0_77 = arith.constant 0 : index
    %195 = vector.load %arg1[%c72, %c0_77] : memref<98x256xf32, #tpu.memory_space<vmem>>, vector<1x256xf32>
    %196 = arith.mulf %191, %195 : vector<1x256xf32>
    %197 = arith.addf %194, %196 : vector<1x256xf32>
    %c24 = arith.constant 24 : index
    %c0_78 = arith.constant 0 : index
    %198 = vector.load %arg1[%c24, %c0_78] : memref<98x256xf32, #tpu.memory_space<vmem>>, vector<1x256xf32>
    %199 = arith.mulf %3, %198 : vector<1x256xf32>
    %200 = arith.addf %197, %199 : vector<1x256xf32>
    %c73 = arith.constant 73 : index
    %c0_79 = arith.constant 0 : index
    %201 = vector.load %arg1[%c73, %c0_79] : memref<98x256xf32, #tpu.memory_space<vmem>>, vector<1x256xf32>
    %202 = arith.mulf %4, %201 : vector<1x256xf32>
    %203 = arith.addf %200, %202 : vector<1x256xf32>
    %c255_i32 = arith.constant 255 : i32
    %204 = tpu.dynamic_rotate %3 by %c255_i32 dim 1 : vector<1x256xf32>, i32 -> vector<1x256xf32>
    %c255_i32_80 = arith.constant 255 : i32
    %205 = tpu.dynamic_rotate %4 by %c255_i32_80 dim 1 : vector<1x256xf32>, i32 -> vector<1x256xf32>
    %c25 = arith.constant 25 : index
    %c0_81 = arith.constant 0 : index
    %206 = vector.load %arg1[%c25, %c0_81] : memref<98x256xf32, #tpu.memory_space<vmem>>, vector<1x256xf32>
    %207 = arith.mulf %204, %206 : vector<1x256xf32>
    %208 = arith.addf %203, %207 : vector<1x256xf32>
    %c74 = arith.constant 74 : index
    %c0_82 = arith.constant 0 : index
    %209 = vector.load %arg1[%c74, %c0_82] : memref<98x256xf32, #tpu.memory_space<vmem>>, vector<1x256xf32>
    %210 = arith.mulf %205, %209 : vector<1x256xf32>
    %211 = arith.addf %208, %210 : vector<1x256xf32>
    %c254_i32 = arith.constant 254 : i32
    %212 = tpu.dynamic_rotate %3 by %c254_i32 dim 1 : vector<1x256xf32>, i32 -> vector<1x256xf32>
    %c254_i32_83 = arith.constant 254 : i32
    %213 = tpu.dynamic_rotate %4 by %c254_i32_83 dim 1 : vector<1x256xf32>, i32 -> vector<1x256xf32>
    %c26 = arith.constant 26 : index
    %c0_84 = arith.constant 0 : index
    %214 = vector.load %arg1[%c26, %c0_84] : memref<98x256xf32, #tpu.memory_space<vmem>>, vector<1x256xf32>
    %215 = arith.mulf %212, %214 : vector<1x256xf32>
    %216 = arith.addf %211, %215 : vector<1x256xf32>
    %c75 = arith.constant 75 : index
    %c0_85 = arith.constant 0 : index
    %217 = vector.load %arg1[%c75, %c0_85] : memref<98x256xf32, #tpu.memory_space<vmem>>, vector<1x256xf32>
    %218 = arith.mulf %213, %217 : vector<1x256xf32>
    %219 = arith.addf %216, %218 : vector<1x256xf32>
    %c253_i32 = arith.constant 253 : i32
    %220 = tpu.dynamic_rotate %3 by %c253_i32 dim 1 : vector<1x256xf32>, i32 -> vector<1x256xf32>
    %c253_i32_86 = arith.constant 253 : i32
    %221 = tpu.dynamic_rotate %4 by %c253_i32_86 dim 1 : vector<1x256xf32>, i32 -> vector<1x256xf32>
    %c27 = arith.constant 27 : index
    %c0_87 = arith.constant 0 : index
    %222 = vector.load %arg1[%c27, %c0_87] : memref<98x256xf32, #tpu.memory_space<vmem>>, vector<1x256xf32>
    %223 = arith.mulf %220, %222 : vector<1x256xf32>
    %224 = arith.addf %219, %223 : vector<1x256xf32>
    %c76 = arith.constant 76 : index
    %c0_88 = arith.constant 0 : index
    %225 = vector.load %arg1[%c76, %c0_88] : memref<98x256xf32, #tpu.memory_space<vmem>>, vector<1x256xf32>
    %226 = arith.mulf %221, %225 : vector<1x256xf32>
    %227 = arith.addf %224, %226 : vector<1x256xf32>
    %c243_i32 = arith.constant 243 : i32
    %228 = tpu.dynamic_rotate %3 by %c243_i32 dim 1 : vector<1x256xf32>, i32 -> vector<1x256xf32>
    %c243_i32_89 = arith.constant 243 : i32
    %229 = tpu.dynamic_rotate %4 by %c243_i32_89 dim 1 : vector<1x256xf32>, i32 -> vector<1x256xf32>
    %c28 = arith.constant 28 : index
    %c0_90 = arith.constant 0 : index
    %230 = vector.load %arg1[%c28, %c0_90] : memref<98x256xf32, #tpu.memory_space<vmem>>, vector<1x256xf32>
    %231 = arith.mulf %228, %230 : vector<1x256xf32>
    %232 = arith.addf %227, %231 : vector<1x256xf32>
    %c77 = arith.constant 77 : index
    %c0_91 = arith.constant 0 : index
    %233 = vector.load %arg1[%c77, %c0_91] : memref<98x256xf32, #tpu.memory_space<vmem>>, vector<1x256xf32>
    %234 = arith.mulf %229, %233 : vector<1x256xf32>
    %235 = arith.addf %232, %234 : vector<1x256xf32>
    %c242_i32 = arith.constant 242 : i32
    %236 = tpu.dynamic_rotate %3 by %c242_i32 dim 1 : vector<1x256xf32>, i32 -> vector<1x256xf32>
    %c242_i32_92 = arith.constant 242 : i32
    %237 = tpu.dynamic_rotate %4 by %c242_i32_92 dim 1 : vector<1x256xf32>, i32 -> vector<1x256xf32>
    %c29 = arith.constant 29 : index
    %c0_93 = arith.constant 0 : index
    %238 = vector.load %arg1[%c29, %c0_93] : memref<98x256xf32, #tpu.memory_space<vmem>>, vector<1x256xf32>
    %239 = arith.mulf %236, %238 : vector<1x256xf32>
    %240 = arith.addf %235, %239 : vector<1x256xf32>
    %c78 = arith.constant 78 : index
    %c0_94 = arith.constant 0 : index
    %241 = vector.load %arg1[%c78, %c0_94] : memref<98x256xf32, #tpu.memory_space<vmem>>, vector<1x256xf32>
    %242 = arith.mulf %237, %241 : vector<1x256xf32>
    %243 = arith.addf %240, %242 : vector<1x256xf32>
    %c241_i32 = arith.constant 241 : i32
    %244 = tpu.dynamic_rotate %3 by %c241_i32 dim 1 : vector<1x256xf32>, i32 -> vector<1x256xf32>
    %c241_i32_95 = arith.constant 241 : i32
    %245 = tpu.dynamic_rotate %4 by %c241_i32_95 dim 1 : vector<1x256xf32>, i32 -> vector<1x256xf32>
    %c30 = arith.constant 30 : index
    %c0_96 = arith.constant 0 : index
    %246 = vector.load %arg1[%c30, %c0_96] : memref<98x256xf32, #tpu.memory_space<vmem>>, vector<1x256xf32>
    %247 = arith.mulf %244, %246 : vector<1x256xf32>
    %248 = arith.addf %243, %247 : vector<1x256xf32>
    %c79 = arith.constant 79 : index
    %c0_97 = arith.constant 0 : index
    %249 = vector.load %arg1[%c79, %c0_97] : memref<98x256xf32, #tpu.memory_space<vmem>>, vector<1x256xf32>
    %250 = arith.mulf %245, %249 : vector<1x256xf32>
    %251 = arith.addf %248, %250 : vector<1x256xf32>
    %c240_i32 = arith.constant 240 : i32
    %252 = tpu.dynamic_rotate %3 by %c240_i32 dim 1 : vector<1x256xf32>, i32 -> vector<1x256xf32>
    %c240_i32_98 = arith.constant 240 : i32
    %253 = tpu.dynamic_rotate %4 by %c240_i32_98 dim 1 : vector<1x256xf32>, i32 -> vector<1x256xf32>
    %c31 = arith.constant 31 : index
    %c0_99 = arith.constant 0 : index
    %254 = vector.load %arg1[%c31, %c0_99] : memref<98x256xf32, #tpu.memory_space<vmem>>, vector<1x256xf32>
    %255 = arith.mulf %252, %254 : vector<1x256xf32>
    %256 = arith.addf %251, %255 : vector<1x256xf32>
    %c80 = arith.constant 80 : index
    %c0_100 = arith.constant 0 : index
    %257 = vector.load %arg1[%c80, %c0_100] : memref<98x256xf32, #tpu.memory_space<vmem>>, vector<1x256xf32>
    %258 = arith.mulf %253, %257 : vector<1x256xf32>
    %259 = arith.addf %256, %258 : vector<1x256xf32>
    %c239_i32 = arith.constant 239 : i32
    %260 = tpu.dynamic_rotate %3 by %c239_i32 dim 1 : vector<1x256xf32>, i32 -> vector<1x256xf32>
    %c239_i32_101 = arith.constant 239 : i32
    %261 = tpu.dynamic_rotate %4 by %c239_i32_101 dim 1 : vector<1x256xf32>, i32 -> vector<1x256xf32>
    %c32 = arith.constant 32 : index
    %c0_102 = arith.constant 0 : index
    %262 = vector.load %arg1[%c32, %c0_102] : memref<98x256xf32, #tpu.memory_space<vmem>>, vector<1x256xf32>
    %263 = arith.mulf %260, %262 : vector<1x256xf32>
    %264 = arith.addf %259, %263 : vector<1x256xf32>
    %c81 = arith.constant 81 : index
    %c0_103 = arith.constant 0 : index
    %265 = vector.load %arg1[%c81, %c0_103] : memref<98x256xf32, #tpu.memory_space<vmem>>, vector<1x256xf32>
    %266 = arith.mulf %261, %265 : vector<1x256xf32>
    %267 = arith.addf %264, %266 : vector<1x256xf32>
    %c238_i32 = arith.constant 238 : i32
    %268 = tpu.dynamic_rotate %3 by %c238_i32 dim 1 : vector<1x256xf32>, i32 -> vector<1x256xf32>
    %c238_i32_104 = arith.constant 238 : i32
    %269 = tpu.dynamic_rotate %4 by %c238_i32_104 dim 1 : vector<1x256xf32>, i32 -> vector<1x256xf32>
    %c33 = arith.constant 33 : index
    %c0_105 = arith.constant 0 : index
    %270 = vector.load %arg1[%c33, %c0_105] : memref<98x256xf32, #tpu.memory_space<vmem>>, vector<1x256xf32>
    %271 = arith.mulf %268, %270 : vector<1x256xf32>
    %272 = arith.addf %267, %271 : vector<1x256xf32>
    %c82 = arith.constant 82 : index
    %c0_106 = arith.constant 0 : index
    %273 = vector.load %arg1[%c82, %c0_106] : memref<98x256xf32, #tpu.memory_space<vmem>>, vector<1x256xf32>
    %274 = arith.mulf %269, %273 : vector<1x256xf32>
    %275 = arith.addf %272, %274 : vector<1x256xf32>
    %c237_i32 = arith.constant 237 : i32
    %276 = tpu.dynamic_rotate %3 by %c237_i32 dim 1 : vector<1x256xf32>, i32 -> vector<1x256xf32>
    %c237_i32_107 = arith.constant 237 : i32
    %277 = tpu.dynamic_rotate %4 by %c237_i32_107 dim 1 : vector<1x256xf32>, i32 -> vector<1x256xf32>
    %c34 = arith.constant 34 : index
    %c0_108 = arith.constant 0 : index
    %278 = vector.load %arg1[%c34, %c0_108] : memref<98x256xf32, #tpu.memory_space<vmem>>, vector<1x256xf32>
    %279 = arith.mulf %276, %278 : vector<1x256xf32>
    %280 = arith.addf %275, %279 : vector<1x256xf32>
    %c83 = arith.constant 83 : index
    %c0_109 = arith.constant 0 : index
    %281 = vector.load %arg1[%c83, %c0_109] : memref<98x256xf32, #tpu.memory_space<vmem>>, vector<1x256xf32>
    %282 = arith.mulf %277, %281 : vector<1x256xf32>
    %283 = arith.addf %280, %282 : vector<1x256xf32>
    %c227_i32 = arith.constant 227 : i32
    %284 = tpu.dynamic_rotate %3 by %c227_i32 dim 1 : vector<1x256xf32>, i32 -> vector<1x256xf32>
    %c227_i32_110 = arith.constant 227 : i32
    %285 = tpu.dynamic_rotate %4 by %c227_i32_110 dim 1 : vector<1x256xf32>, i32 -> vector<1x256xf32>
    %c35 = arith.constant 35 : index
    %c0_111 = arith.constant 0 : index
    %286 = vector.load %arg1[%c35, %c0_111] : memref<98x256xf32, #tpu.memory_space<vmem>>, vector<1x256xf32>
    %287 = arith.mulf %284, %286 : vector<1x256xf32>
    %288 = arith.addf %283, %287 : vector<1x256xf32>
    %c84 = arith.constant 84 : index
    %c0_112 = arith.constant 0 : index
    %289 = vector.load %arg1[%c84, %c0_112] : memref<98x256xf32, #tpu.memory_space<vmem>>, vector<1x256xf32>
    %290 = arith.mulf %285, %289 : vector<1x256xf32>
    %291 = arith.addf %288, %290 : vector<1x256xf32>
    %c226_i32 = arith.constant 226 : i32
    %292 = tpu.dynamic_rotate %3 by %c226_i32 dim 1 : vector<1x256xf32>, i32 -> vector<1x256xf32>
    %c226_i32_113 = arith.constant 226 : i32
    %293 = tpu.dynamic_rotate %4 by %c226_i32_113 dim 1 : vector<1x256xf32>, i32 -> vector<1x256xf32>
    %c36 = arith.constant 36 : index
    %c0_114 = arith.constant 0 : index
    %294 = vector.load %arg1[%c36, %c0_114] : memref<98x256xf32, #tpu.memory_space<vmem>>, vector<1x256xf32>
    %295 = arith.mulf %292, %294 : vector<1x256xf32>
    %296 = arith.addf %291, %295 : vector<1x256xf32>
    %c85 = arith.constant 85 : index
    %c0_115 = arith.constant 0 : index
    %297 = vector.load %arg1[%c85, %c0_115] : memref<98x256xf32, #tpu.memory_space<vmem>>, vector<1x256xf32>
    %298 = arith.mulf %293, %297 : vector<1x256xf32>
    %299 = arith.addf %296, %298 : vector<1x256xf32>
    %c225_i32 = arith.constant 225 : i32
    %300 = tpu.dynamic_rotate %3 by %c225_i32 dim 1 : vector<1x256xf32>, i32 -> vector<1x256xf32>
    %c225_i32_116 = arith.constant 225 : i32
    %301 = tpu.dynamic_rotate %4 by %c225_i32_116 dim 1 : vector<1x256xf32>, i32 -> vector<1x256xf32>
    %c37 = arith.constant 37 : index
    %c0_117 = arith.constant 0 : index
    %302 = vector.load %arg1[%c37, %c0_117] : memref<98x256xf32, #tpu.memory_space<vmem>>, vector<1x256xf32>
    %303 = arith.mulf %300, %302 : vector<1x256xf32>
    %304 = arith.addf %299, %303 : vector<1x256xf32>
    %c86 = arith.constant 86 : index
    %c0_118 = arith.constant 0 : index
    %305 = vector.load %arg1[%c86, %c0_118] : memref<98x256xf32, #tpu.memory_space<vmem>>, vector<1x256xf32>
    %306 = arith.mulf %301, %305 : vector<1x256xf32>
    %307 = arith.addf %304, %306 : vector<1x256xf32>
    %c224_i32 = arith.constant 224 : i32
    %308 = tpu.dynamic_rotate %3 by %c224_i32 dim 1 : vector<1x256xf32>, i32 -> vector<1x256xf32>
    %c224_i32_119 = arith.constant 224 : i32
    %309 = tpu.dynamic_rotate %4 by %c224_i32_119 dim 1 : vector<1x256xf32>, i32 -> vector<1x256xf32>
    %c38 = arith.constant 38 : index
    %c0_120 = arith.constant 0 : index
    %310 = vector.load %arg1[%c38, %c0_120] : memref<98x256xf32, #tpu.memory_space<vmem>>, vector<1x256xf32>
    %311 = arith.mulf %308, %310 : vector<1x256xf32>
    %312 = arith.addf %307, %311 : vector<1x256xf32>
    %c87 = arith.constant 87 : index
    %c0_121 = arith.constant 0 : index
    %313 = vector.load %arg1[%c87, %c0_121] : memref<98x256xf32, #tpu.memory_space<vmem>>, vector<1x256xf32>
    %314 = arith.mulf %309, %313 : vector<1x256xf32>
    %315 = arith.addf %312, %314 : vector<1x256xf32>
    %c223_i32 = arith.constant 223 : i32
    %316 = tpu.dynamic_rotate %3 by %c223_i32 dim 1 : vector<1x256xf32>, i32 -> vector<1x256xf32>
    %c223_i32_122 = arith.constant 223 : i32
    %317 = tpu.dynamic_rotate %4 by %c223_i32_122 dim 1 : vector<1x256xf32>, i32 -> vector<1x256xf32>
    %c39 = arith.constant 39 : index
    %c0_123 = arith.constant 0 : index
    %318 = vector.load %arg1[%c39, %c0_123] : memref<98x256xf32, #tpu.memory_space<vmem>>, vector<1x256xf32>
    %319 = arith.mulf %316, %318 : vector<1x256xf32>
    %320 = arith.addf %315, %319 : vector<1x256xf32>
    %c88 = arith.constant 88 : index
    %c0_124 = arith.constant 0 : index
    %321 = vector.load %arg1[%c88, %c0_124] : memref<98x256xf32, #tpu.memory_space<vmem>>, vector<1x256xf32>
    %322 = arith.mulf %317, %321 : vector<1x256xf32>
    %323 = arith.addf %320, %322 : vector<1x256xf32>
    %c222_i32 = arith.constant 222 : i32
    %324 = tpu.dynamic_rotate %3 by %c222_i32 dim 1 : vector<1x256xf32>, i32 -> vector<1x256xf32>
    %c222_i32_125 = arith.constant 222 : i32
    %325 = tpu.dynamic_rotate %4 by %c222_i32_125 dim 1 : vector<1x256xf32>, i32 -> vector<1x256xf32>
    %c40 = arith.constant 40 : index
    %c0_126 = arith.constant 0 : index
    %326 = vector.load %arg1[%c40, %c0_126] : memref<98x256xf32, #tpu.memory_space<vmem>>, vector<1x256xf32>
    %327 = arith.mulf %324, %326 : vector<1x256xf32>
    %328 = arith.addf %323, %327 : vector<1x256xf32>
    %c89 = arith.constant 89 : index
    %c0_127 = arith.constant 0 : index
    %329 = vector.load %arg1[%c89, %c0_127] : memref<98x256xf32, #tpu.memory_space<vmem>>, vector<1x256xf32>
    %330 = arith.mulf %325, %329 : vector<1x256xf32>
    %331 = arith.addf %328, %330 : vector<1x256xf32>
    %c221_i32 = arith.constant 221 : i32
    %332 = tpu.dynamic_rotate %3 by %c221_i32 dim 1 : vector<1x256xf32>, i32 -> vector<1x256xf32>
    %c221_i32_128 = arith.constant 221 : i32
    %333 = tpu.dynamic_rotate %4 by %c221_i32_128 dim 1 : vector<1x256xf32>, i32 -> vector<1x256xf32>
    %c41 = arith.constant 41 : index
    %c0_129 = arith.constant 0 : index
    %334 = vector.load %arg1[%c41, %c0_129] : memref<98x256xf32, #tpu.memory_space<vmem>>, vector<1x256xf32>
    %335 = arith.mulf %332, %334 : vector<1x256xf32>
    %336 = arith.addf %331, %335 : vector<1x256xf32>
    %c90 = arith.constant 90 : index
    %c0_130 = arith.constant 0 : index
    %337 = vector.load %arg1[%c90, %c0_130] : memref<98x256xf32, #tpu.memory_space<vmem>>, vector<1x256xf32>
    %338 = arith.mulf %333, %337 : vector<1x256xf32>
    %339 = arith.addf %336, %338 : vector<1x256xf32>
    %c211_i32 = arith.constant 211 : i32
    %340 = tpu.dynamic_rotate %3 by %c211_i32 dim 1 : vector<1x256xf32>, i32 -> vector<1x256xf32>
    %c211_i32_131 = arith.constant 211 : i32
    %341 = tpu.dynamic_rotate %4 by %c211_i32_131 dim 1 : vector<1x256xf32>, i32 -> vector<1x256xf32>
    %c42 = arith.constant 42 : index
    %c0_132 = arith.constant 0 : index
    %342 = vector.load %arg1[%c42, %c0_132] : memref<98x256xf32, #tpu.memory_space<vmem>>, vector<1x256xf32>
    %343 = arith.mulf %340, %342 : vector<1x256xf32>
    %344 = arith.addf %339, %343 : vector<1x256xf32>
    %c91 = arith.constant 91 : index
    %c0_133 = arith.constant 0 : index
    %345 = vector.load %arg1[%c91, %c0_133] : memref<98x256xf32, #tpu.memory_space<vmem>>, vector<1x256xf32>
    %346 = arith.mulf %341, %345 : vector<1x256xf32>
    %347 = arith.addf %344, %346 : vector<1x256xf32>
    %c210_i32 = arith.constant 210 : i32
    %348 = tpu.dynamic_rotate %3 by %c210_i32 dim 1 : vector<1x256xf32>, i32 -> vector<1x256xf32>
    %c210_i32_134 = arith.constant 210 : i32
    %349 = tpu.dynamic_rotate %4 by %c210_i32_134 dim 1 : vector<1x256xf32>, i32 -> vector<1x256xf32>
    %c43 = arith.constant 43 : index
    %c0_135 = arith.constant 0 : index
    %350 = vector.load %arg1[%c43, %c0_135] : memref<98x256xf32, #tpu.memory_space<vmem>>, vector<1x256xf32>
    %351 = arith.mulf %348, %350 : vector<1x256xf32>
    %352 = arith.addf %347, %351 : vector<1x256xf32>
    %c92 = arith.constant 92 : index
    %c0_136 = arith.constant 0 : index
    %353 = vector.load %arg1[%c92, %c0_136] : memref<98x256xf32, #tpu.memory_space<vmem>>, vector<1x256xf32>
    %354 = arith.mulf %349, %353 : vector<1x256xf32>
    %355 = arith.addf %352, %354 : vector<1x256xf32>
    %c209_i32 = arith.constant 209 : i32
    %356 = tpu.dynamic_rotate %3 by %c209_i32 dim 1 : vector<1x256xf32>, i32 -> vector<1x256xf32>
    %c209_i32_137 = arith.constant 209 : i32
    %357 = tpu.dynamic_rotate %4 by %c209_i32_137 dim 1 : vector<1x256xf32>, i32 -> vector<1x256xf32>
    %c44 = arith.constant 44 : index
    %c0_138 = arith.constant 0 : index
    %358 = vector.load %arg1[%c44, %c0_138] : memref<98x256xf32, #tpu.memory_space<vmem>>, vector<1x256xf32>
    %359 = arith.mulf %356, %358 : vector<1x256xf32>
    %360 = arith.addf %355, %359 : vector<1x256xf32>
    %c93 = arith.constant 93 : index
    %c0_139 = arith.constant 0 : index
    %361 = vector.load %arg1[%c93, %c0_139] : memref<98x256xf32, #tpu.memory_space<vmem>>, vector<1x256xf32>
    %362 = arith.mulf %357, %361 : vector<1x256xf32>
    %363 = arith.addf %360, %362 : vector<1x256xf32>
    %c208_i32 = arith.constant 208 : i32
    %364 = tpu.dynamic_rotate %3 by %c208_i32 dim 1 : vector<1x256xf32>, i32 -> vector<1x256xf32>
    %c208_i32_140 = arith.constant 208 : i32
    %365 = tpu.dynamic_rotate %4 by %c208_i32_140 dim 1 : vector<1x256xf32>, i32 -> vector<1x256xf32>
    %c45 = arith.constant 45 : index
    %c0_141 = arith.constant 0 : index
    %366 = vector.load %arg1[%c45, %c0_141] : memref<98x256xf32, #tpu.memory_space<vmem>>, vector<1x256xf32>
    %367 = arith.mulf %364, %366 : vector<1x256xf32>
    %368 = arith.addf %363, %367 : vector<1x256xf32>
    %c94 = arith.constant 94 : index
    %c0_142 = arith.constant 0 : index
    %369 = vector.load %arg1[%c94, %c0_142] : memref<98x256xf32, #tpu.memory_space<vmem>>, vector<1x256xf32>
    %370 = arith.mulf %365, %369 : vector<1x256xf32>
    %371 = arith.addf %368, %370 : vector<1x256xf32>
    %c207_i32 = arith.constant 207 : i32
    %372 = tpu.dynamic_rotate %3 by %c207_i32 dim 1 : vector<1x256xf32>, i32 -> vector<1x256xf32>
    %c207_i32_143 = arith.constant 207 : i32
    %373 = tpu.dynamic_rotate %4 by %c207_i32_143 dim 1 : vector<1x256xf32>, i32 -> vector<1x256xf32>
    %c46 = arith.constant 46 : index
    %c0_144 = arith.constant 0 : index
    %374 = vector.load %arg1[%c46, %c0_144] : memref<98x256xf32, #tpu.memory_space<vmem>>, vector<1x256xf32>
    %375 = arith.mulf %372, %374 : vector<1x256xf32>
    %376 = arith.addf %371, %375 : vector<1x256xf32>
    %c95 = arith.constant 95 : index
    %c0_145 = arith.constant 0 : index
    %377 = vector.load %arg1[%c95, %c0_145] : memref<98x256xf32, #tpu.memory_space<vmem>>, vector<1x256xf32>
    %378 = arith.mulf %373, %377 : vector<1x256xf32>
    %379 = arith.addf %376, %378 : vector<1x256xf32>
    %c206_i32 = arith.constant 206 : i32
    %380 = tpu.dynamic_rotate %3 by %c206_i32 dim 1 : vector<1x256xf32>, i32 -> vector<1x256xf32>
    %c206_i32_146 = arith.constant 206 : i32
    %381 = tpu.dynamic_rotate %4 by %c206_i32_146 dim 1 : vector<1x256xf32>, i32 -> vector<1x256xf32>
    %c47 = arith.constant 47 : index
    %c0_147 = arith.constant 0 : index
    %382 = vector.load %arg1[%c47, %c0_147] : memref<98x256xf32, #tpu.memory_space<vmem>>, vector<1x256xf32>
    %383 = arith.mulf %380, %382 : vector<1x256xf32>
    %384 = arith.addf %379, %383 : vector<1x256xf32>
    %c96 = arith.constant 96 : index
    %c0_148 = arith.constant 0 : index
    %385 = vector.load %arg1[%c96, %c0_148] : memref<98x256xf32, #tpu.memory_space<vmem>>, vector<1x256xf32>
    %386 = arith.mulf %381, %385 : vector<1x256xf32>
    %387 = arith.addf %384, %386 : vector<1x256xf32>
    %c205_i32 = arith.constant 205 : i32
    %388 = tpu.dynamic_rotate %3 by %c205_i32 dim 1 : vector<1x256xf32>, i32 -> vector<1x256xf32>
    %c205_i32_149 = arith.constant 205 : i32
    %389 = tpu.dynamic_rotate %4 by %c205_i32_149 dim 1 : vector<1x256xf32>, i32 -> vector<1x256xf32>
    %c48 = arith.constant 48 : index
    %c0_150 = arith.constant 0 : index
    %390 = vector.load %arg1[%c48, %c0_150] : memref<98x256xf32, #tpu.memory_space<vmem>>, vector<1x256xf32>
    %391 = arith.mulf %388, %390 : vector<1x256xf32>
    %392 = arith.addf %387, %391 : vector<1x256xf32>
    %c97 = arith.constant 97 : index
    %c0_151 = arith.constant 0 : index
    %393 = vector.load %arg1[%c97, %c0_151] : memref<98x256xf32, #tpu.memory_space<vmem>>, vector<1x256xf32>
    %394 = arith.mulf %389, %393 : vector<1x256xf32>
    %395 = arith.addf %392, %394 : vector<1x256xf32>
    %396 = arith.negf %395 : vector<1x256xf32>
    %397 = math.exp %396 : vector<1x256xf32>
    %cst_152 = arith.constant 1.000000e+00 : f32
    %398 = vector.broadcast %cst_152 : f32 to vector<1x256xf32>
    %399 = arith.addf %398, %397 : vector<1x256xf32>
    %400 = arith.divf %398, %399 : vector<1x256xf32>
    %c0_153 = arith.constant 0 : index
    %c0_154 = arith.constant 0 : index
    %c0_155 = arith.constant 0 : index
    %401 = vector.load %arg2[%c0_153, %c0_154, %c0_155] : memref<1x8x256xf32, #tpu.memory_space<vmem>>, vector<1x8x256xf32>
    %402 = vector.shape_cast %400 : vector<1x256xf32> to vector<1x1x256xf32>
    %403 = vector.broadcast %402 : vector<1x1x256xf32> to vector<1x8x256xf32>
    %404 = arith.mulf %401, %403 : vector<1x8x256xf32>
    %c0_156 = arith.constant 0 : index
    %c0_157 = arith.constant 0 : index
    %c0_158 = arith.constant 0 : index
    %405 = vector.load %arg3[%c0_156, %c0_157, %c0_158] : memref<1x8x256xf32, #tpu.memory_space<vmem>>, vector<1x8x256xf32>
    tpu.vector_store %arg3[%c0_156, %c0_157, %c0_158], %404 {strides = array<i32>} : memref<1x8x256xf32, #tpu.memory_space<vmem>>, vector<1x8x256xf32>,
    return
  }
  func.func @transform_0(%arg0: i32) -> (i32, i32) {
    %c0_i32 = arith.constant 0 : i32
    %c0_i32_0 = arith.constant 0 : i32
    %c0_i32_1 = arith.constant 0 : i32
    return %c0_i32, %c0_i32_0 : i32, i32
  }
  func.func @transform_1(%arg0: i32) -> (i32, i32, i32) {
    %c0_i32 = arith.constant 0 : i32
    %c0_i32_0 = arith.constant 0 : i32
    %c0_i32_1 = arith.constant 0 : i32
    return %arg0, %c0_i32, %c0_i32_0 : i32, i32, i32
  }
  func.func @transform_2(%arg0: i32) -> (i32, i32, i32) {
    %c0_i32 = arith.constant 0 : i32
    %c0_i32_0 = arith.constant 0 : i32
    %c0_i32_1 = arith.constant 0 : i32
    return %arg0, %c0_i32, %c0_i32_0 : i32, i32, i32
  }
}

</mosaic_0001>

<bundles_post_ra>
// kernel: sa_forward.1
= control target key start
LH: loop header
LB: loop body
LE: loop exit
PB: predicated region body
PF: predicated region fallthrough
CT: control target
= control target key end

     0   :  { %s2792_s9 = smov 0   ;;  %s4870_s0 = inlined_call_operand.vmem [shape: f32[98,256], index: 0, kind: input, shape index: {}]   ;;  %s4871_s1 = inlined_call_operand.vmem [shape: f32[2,8,256], index: 1, kind: input, shape index: {}]   ;;  %s4872_s2 = inlined_call_operand.vmem [shape: f32[2,8,256], index: 2, kind: output, shape index: {}]  }
   0x1 LB: > { %s2543_s10 = sadd.s32 4294967295, %s2727_s9   ;;  %p2547_p0 = scmp.ge.s32.totalorder %s2727_s9, 1  ;;  %s2727_s9 = sphi %s2792_s9, %s12_s9  }
   0x2   : > { %p112_p1 = scmp.lt.s32.totalorder %s2727_s9, 3 }
   0x4   : > { %p113_p2 = pnand %p2547_p0, %p112_p1 }
   0x6   : > { %116 = sbr.rel (%p113_p2) target bundleno = 564 (0x234), region = 28 }
   0xd   : > { %p134_p3 = scmp.lt.s32.totalorder %s2543_s10, 1  ;;  %s2729_s15 = smov 50  }
   0xe   : > { %s2730_s16 = smov 51   ;;  %s2731_s17 = smov 49  }
   0xf   : > { %s4913_s10 = smov (!%p134_p3, %s2543_s10), 1  ;;  %s2732_s18 = smov 48  }
  0x10   : > { %s2653_s11 = sshll.u32 %s4913_s10, 4  ;;  %s2733_s19 = smov 47  }
  0x11   : > { %s2808_s14 = scalar_lea.vmem %s4871_s1, %s2653_s11  ;;  %s2734_s20 = smov 46  }
  0x12   : > { %v144_v0 = vld [vmem:[%s2808_s14] sm:$0xff]  ;;  %v145_v1 = vld [vmem:[%s2808_s14 + $0x8] sm:$0xff]  ;;  %s2735_s21 = smov 45   ;;  %s2736_s22 = smov 35  }
  0x13   : > { %v146_v2 = vrot.slane %v144_v0, 4  ;;  %v152_v3 = vrot.slane %v145_v1, 4  ;;  %s2737_s23 = smov 34   ;;  %s2738_s24 = smov 33  }
  0x14   : > { %s2739_s25 = smov 32   ;;  %s2740_s26 = smov 31  }
  0x15   : > { %v162_v4 = vmax.f32 %v144_v0, %v146_v2  ;;  %v168_v5 = vmax.f32 %v145_v1, %v152_v3  ;;  %v147_v6 = vadd.f32 %v146_v2, %v144_v0  ;;  %v153_v7 = vadd.f32 %v152_v3, %v145_v1  ;;  %s2741_s27 = smov 30   ;;  %s2742_s28 = smov 29  }
  0x16   : > { %s2743_s29 = smov 19   ;;  %s2744_s30 = smov 18   ;;  %v177_v0 = vlaneseq }
  0x17   : > { %v163_v8 = vrot.slane %v162_v4, 2  ;;  %v169_v9 = vrot.slane %v168_v5, 2  ;;  %v148_v10 = vrot.slane %v147_v6, 2  ;;  %v154_v11 = vrot.slane %v153_v7, 2  ;;  %s2745_s3 = smov 17   ;;  %s2746_s4 = smov 16  }
  0x18   : > { %s2747_s5 = smov 15   ;;  %s2748_s6 = smov 14   ;;  %v191_v3 = vshrl.u32 %v177_v0, 7 }
  0x19   : > { %v164_v12 = vmax.f32 %v162_v4, %v163_v8  ;;  %v170_v13 = vmax.f32 %v168_v5, %v169_v9  ;;  %v149_v14 = vadd.f32 %v148_v10, %v147_v6  ;;  %v155_v18 = vadd.f32 %v154_v11, %v153_v7  ;;  %s2749_s7 = smov 13   ;;  %s2750_s8 = smov 3   ;;  %v188_v8 = vld [vmem:[%s4870_s0] ss:$8 sm:$0x3] }
  0x1a   : > { %s2751_s12 = smov 2   ;;  %s2752_s13 = smov 1   ;;  %v3002_v6 = vand.u32 127, %v177_v0  ;;  %v3004_v7 = vsub.s32 0, %v191_v3  ;;  %v3010_v9 = vsub.s32 1, %v191_v3 }
  0x1b   : > { %v165_v15 = vrot.slane %v164_v12, 1  ;;  %v171_v16 = vrot.slane %v170_v13, 1  ;;  %v150_v17 = vrot.slane %v149_v14, 1  ;;  %v156_v22 = vrot.slane %v155_v18, 1 }
  0x1c   : > { %v2552_v10 = vld [vmem:[%s4870_s0 + $0x61] ss:$8 sm:$0x3]  ;;  %vm179_vm0 = vcmp.lt.s32.totalorder %v3002_v6, 51  ;;  %vm225_vm1 = vcmp.lt.s32.totalorder %v3002_v6, 50  ;;  %vm272_vm2 = vcmp.lt.s32.totalorder %v3002_v6, 49 }
  0x1d   : > { %v2812_v19 = vmax.f32 %v164_v12, %v165_v15  ;;  %v2816_v20 = vmax.f32 %v170_v13, %v171_v16  ;;  %v151_v21 = vadd.f32 %v150_v17, %v149_v14  ;;  %v157_v24 = vadd.f32 %v156_v22, %v155_v18  ;;  %v2553_v11 = vld [vmem:[%s4870_s0 + $0x1] ss:$8 sm:$0x3] }
  0x1e   : > { %v193_v14 = vrot.slane %v188_v8, %v3004_v7  ;;  %v197_v15 = vrot.slane %v188_v8, %v3010_v9  ;;  %v210_v16 = vrot.slane %v2552_v10, %v3004_v7  ;;  %v240_v22 = vrot.slane %v2553_v11, %v3004_v7 }
  0x1f   : > { %228 = vrot.lane.b32.xlu0 %v2812_v19, %s2729_s15  ;;  %182 = vrot.lane.b32.xlu1 %v2812_v19, %s2730_s16  ;;  %v2820_v23 = vmul.f32 0.125, %v151_v21  ;;  %v2824_v25 = vmul.f32 0.125, %v157_v24  ;;  %v214_v21 = vrot.slane %v2552_v10, %v3010_v9  ;;  %v244_v24 = vrot.slane %v2553_v11, %v3010_v9 }
  0x20   : > { %vm319_vm3 = vcmp.lt.s32.totalorder %v3002_v6, 48  ;;  %vm366_vm4 = vcmp.lt.s32.totalorder %v3002_v6, 47  ;;  %vm413_vm5 = vcmp.lt.s32.totalorder %v3002_v6, 46  ;;  %vm460_vm6 = vcmp.lt.s32.totalorder %v3002_v6, 45 }
  0x21   : > { %vm507_vm7 = vcmp.lt.s32.totalorder %v3002_v6, 35  ;;  %vm554_vm8 = vcmp.lt.s32.totalorder %v3002_v6, 34  ;;  %vm601_vm9 = vcmp.lt.s32.totalorder %v3002_v6, 33  ;;  %vm648_vm10 = vcmp.lt.s32.totalorder %v3002_v6, 32 }
  0x22   : > { %vm695_vm11 = vcmp.lt.s32.totalorder %v3002_v6, 31  ;;  %vm742_vm12 = vcmp.lt.s32.totalorder %v3002_v6, 30  ;;  %vm789_vm13 = vcmp.lt.s32.totalorder %v3002_v6, 29  ;;  %vm836_vm14 = vcmp.lt.s32.totalorder %v3002_v6, 19 }
  0x23   : > { %275 = vrot.lane.b32.xlu0 %v2812_v19, %s2731_s17  ;;  %184 = vrot.lane.b32.xlu1 %v2816_v20, %s2730_s16  ;;  %vm883_vm15 = vcmp.lt.s32.totalorder %v3002_v6, 18 }
  0x27   : > { %230 = vrot.lane.b32.xlu1 %v2816_v20, %s2729_s15  ;;  %173 = vrot.lane.b32.xlu0 %v2820_v23, %s2730_s16 }
  0x2b   : > { %277 = vrot.lane.b32.xlu1 %v2816_v20, %s2731_s17  ;;  %175 = vrot.lane.b32.xlu0 %v2824_v25, %s2730_s16  ;;  %s2768_s16 = smov 94  }
  0x2f   : > { %223 = vrot.lane.b32.xlu1 %v2824_v25, %s2729_s15  ;;  %221 = vrot.lane.b32.xlu0 %v2820_v23, %s2729_s15  ;;  %s2753_s15 = smov 127  }
  0x33   : > { %270 = vrot.lane.b32.xlu1 %v2824_v25, %s2731_s17  ;;  %268 = vrot.lane.b32.xlu0 %v2820_v23, %s2731_s17  ;;  %s2773_s17 = smov 80  }
  0x37   : > { %317 = vrot.lane.b32.xlu1 %v2824_v25, %s2732_s18  ;;  %315 = vrot.lane.b32.xlu0 %v2820_v23, %s2732_s18 }
  0x3b   : > { %324 = vrot.lane.b32.xlu1 %v2816_v20, %s2732_s18  ;;  %322 = vrot.lane.b32.xlu0 %v2812_v19, %s2732_s18  ;;  %s2756_s18 = smov 115  }
  0x3f   : > { %364 = vrot.lane.b32.xlu1 %v2824_v25, %s2733_s19  ;;  %362 = vrot.lane.b32.xlu0 %v2820_v23, %s2733_s19 }
  0x43   : > { %371 = vrot.lane.b32.xlu1 %v2816_v20, %s2733_s19  ;;  %369 = vrot.lane.b32.xlu0 %v2812_v19, %s2733_s19 }
  0x47   : > { %411 = vrot.lane.b32.xlu1 %v2824_v25, %s2734_s20  ;;  %409 = vrot.lane.b32.xlu0 %v2820_v23, %s2734_s20 }
  0x4b   : > { %418 = vrot.lane.b32.xlu1 %v2816_v20, %s2734_s20  ;;  %416 = vrot.lane.b32.xlu0 %v2812_v19, %s2734_s20 }
  0x4f   : > { %458 = vrot.lane.b32.xlu1 %v2824_v25, %s2735_s21  ;;  %456 = vrot.lane.b32.xlu0 %v2820_v23, %s2735_s21 }
  0x53   : > { %465 = vrot.lane.b32.xlu1 %v2816_v20, %s2735_s21  ;;  %463 = vrot.lane.b32.xlu0 %v2812_v19, %s2735_s21  ;;  %s2759_s21 = smov 112  }
  0x57   : > { %505 = vrot.lane.b32.xlu1 %v2824_v25, %s2736_s22  ;;  %503 = vrot.lane.b32.xlu0 %v2820_v23, %s2736_s22 }
  0x5b   : > { %512 = vrot.lane.b32.xlu1 %v2816_v20, %s2736_s22  ;;  %510 = vrot.lane.b32.xlu0 %v2812_v19, %s2736_s22  ;;  %s2754_s22 = smov 126  }
  0x5f   : > { %552 = vrot.lane.b32.xlu1 %v2824_v25, %s2737_s23  ;;  %550 = vrot.lane.b32.xlu0 %v2820_v23, %s2737_s23 }
  0x63   : > { %559 = vrot.lane.b32.xlu1 %v2816_v20, %s2737_s23  ;;  %557 = vrot.lane.b32.xlu0 %v2812_v19, %s2737_s23 }
  0x67   : > { %599 = vrot.lane.b32.xlu1 %v2824_v25, %s2738_s24  ;;  %597 = vrot.lane.b32.xlu0 %v2820_v23, %s2738_s24 }
  0x6b   : > { %606 = vrot.lane.b32.xlu1 %v2816_v20, %s2738_s24  ;;  %604 = vrot.lane.b32.xlu0 %v2812_v19, %s2738_s24 }
  0x6f   : > { %646 = vrot.lane.b32.xlu1 %v2824_v25, %s2739_s25  ;;  %644 = vrot.lane.b32.xlu0 %v2820_v23, %s2739_s25 }
  0x73   : > { %653 = vrot.lane.b32.xlu1 %v2816_v20, %s2739_s25  ;;  %651 = vrot.lane.b32.xlu0 %v2812_v19, %s2739_s25  ;;  %s2775_s25 = smov 78  }
  0x77   : > { %693 = vrot.lane.b32.xlu1 %v2824_v25, %s2740_s26  ;;  %691 = vrot.lane.b32.xlu0 %v2820_v23, %s2740_s26 }
  0x7b   : > { %700 = vrot.lane.b32.xlu1 %v2816_v20, %s2740_s26  ;;  %698 = vrot.lane.b32.xlu0 %v2812_v19, %s2740_s26  ;;  %s2770_s26 = smov 83  }
  0x7f   : > { %740 = vrot.lane.b32.xlu1 %v2824_v25, %s2741_s27  ;;  %738 = vrot.lane.b32.xlu0 %v2820_v23, %s2741_s27 }
  0x83   : > { %747 = vrot.lane.b32.xlu1 %v2816_v20, %s2741_s27  ;;  %745 = vrot.lane.b32.xlu0 %v2812_v19, %s2741_s27  ;;  %s2755_s27 = smov 125  }
  0x87   : > { %787 = vrot.lane.b32.xlu1 %v2824_v25, %s2742_s28  ;;  %785 = vrot.lane.b32.xlu0 %v2820_v23, %s2742_s28 }
  0x8b   : > { %794 = vrot.lane.b32.xlu1 %v2816_v20, %s2742_s28  ;;  %792 = vrot.lane.b32.xlu0 %v2812_v19, %s2742_s28 }
  0x8f   : > { %834 = vrot.lane.b32.xlu1 %v2824_v25, %s2743_s29  ;;  %832 = vrot.lane.b32.xlu0 %v2820_v23, %s2743_s29 }
  0x91   : > { %v2878_v26 = vpop.permute.xlu0 %228  ;;  %v2880_v27 = vpop.permute.xlu1 %182 }
  0x93   : > { %841 = vrot.lane.b32.xlu1 %v2816_v20, %s2743_s29  ;;  %839 = vrot.lane.b32.xlu0 %v2812_v19, %s2743_s29  ;;  %s2763_s29 = smov 99  }
  0x95   : > { %v2884_v28 = vpop.permute.xlu0 %275  ;;  %v2886_v29 = vpop.permute.xlu1 %184 }
  0x96   : > { %v186_v0 = vsel %vm179_vm0, %v2880_v27, %v2886_v29  ;;  %v187_v3 = vsel %vm179_vm0, %v2886_v29, %v2880_v27  ;;  %v2554_v27 = vld [vmem:[%s4870_s0 + $0x62] ss:$8 sm:$0x3] }
  0x97   : > { %881 = vrot.lane.b32.xlu1 %v2824_v25, %s2744_s30  ;;  %879 = vrot.lane.b32.xlu0 %v2820_v23, %s2744_s30  ;;  %v217_v29 = vmul.f32 %v210_v16, %v187_v3 }
  0x99   : > { %v2890_v30 = vpop.permute.xlu1 %230  ;;  %v2892_v31 = vpop.permute.xlu0 %173 }
  0x9a   : > { %v232_v16 = vsel %vm225_vm1, %v2878_v26, %v2890_v30 }
  0x9b   : > { %888 = vrot.lane.b32.xlu1 %v2816_v20, %s2744_s30  ;;  %886 = vrot.lane.b32.xlu0 %v2812_v19, %s2744_s30  ;;  %s2760_s30 = smov 111  }
  0x9d   : > { %v2896_v32 = vpop.permute.xlu1 %277  ;;  %v2898_v33 = vpop.permute.xlu0 %175 }
  0x9e   : > { %v180_v17 = vsel %vm179_vm0, %v2892_v31, %v2898_v33  ;;  %v181_v18 = vsel %vm179_vm0, %v2898_v33, %v2892_v31  ;;  %vm930_vm0 = vcmp.lt.s32.totalorder %v3002_v6, 17 }
  0x9f   : > { %928 = vrot.lane.b32.xlu1 %v2824_v25, %s2745_s3  ;;  %926 = vrot.lane.b32.xlu0 %v2820_v23, %s2745_s3  ;;  %v200_v11 = vmul.f32 %v193_v14, %v181_v18 }
  0xa1   : > { %v2902_v34 = vpop.permute.xlu1 %223  ;;  %v2904_v35 = vpop.permute.xlu0 %221  ;;  %v219_v18 = vadd.f32 %v217_v29, %v200_v11  ;;  %v3102_v11 = vld [vmem:[%s4870_s0 + $0x64] ss:$8 sm:$0x3] }
  0xa2   : > { %v226_v31 = vsel %vm225_vm1, %v2904_v35, %v2902_v34  ;;  %v227_v33 = vsel %vm225_vm1, %v2902_v34, %v2904_v35  ;;  %v2555_v34 = vld [vmem:[%s4870_s0 + $0x2] ss:$8 sm:$0x3] }
  0xa3   : > { %935 = vrot.lane.b32.xlu1 %v2816_v20, %s2745_s3  ;;  %933 = vrot.lane.b32.xlu0 %v2812_v19, %s2745_s3  ;;  %s2771_s3 = smov 82  }
  0xa5   : > { %v2908_v36 = vpop.permute.xlu1 %270  ;;  %v2910_v37 = vpop.permute.xlu0 %268 }
  0xa7   : > { %975 = vrot.lane.b32.xlu1 %v2824_v25, %s2746_s4  ;;  %973 = vrot.lane.b32.xlu0 %v2820_v23, %s2746_s4 }
  0xa9   : > { %v2914_v38 = vpop.permute.xlu1 %317  ;;  %v2916_v39 = vpop.permute.xlu0 %315 }
  0xab   : > { %982 = vrot.lane.b32.xlu1 %v2816_v20, %s2746_s4  ;;  %980 = vrot.lane.b32.xlu0 %v2812_v19, %s2746_s4 }
  0xad   : > { %v2920_v40 = vpop.permute.xlu1 %324  ;;  %v2922_v41 = vpop.permute.xlu0 %322 }
  0xaf   : > { %1022 = vrot.lane.b32.xlu1 %v2824_v25, %s2747_s5  ;;  %1020 = vrot.lane.b32.xlu0 %v2820_v23, %s2747_s5 }
  0xb1   : > { %v2926_v42 = vpop.permute.xlu1 %364  ;;  %v2928_v43 = vpop.permute.xlu0 %362 }
  0xb3   : > { %1029 = vrot.lane.b32.xlu1 %v2816_v20, %s2747_s5  ;;  %1027 = vrot.lane.b32.xlu0 %v2812_v19, %s2747_s5  ;;  %s2767_s5 = smov 95  }
  0xb5   : > { %v2932_v44 = vpop.permute.xlu1 %371  ;;  %v2934_v45 = vpop.permute.xlu0 %369 }
  0xb7   : > { %1069 = vrot.lane.b32.xlu1 %v2824_v25, %s2748_s6  ;;  %1067 = vrot.lane.b32.xlu0 %v2820_v23, %s2748_s6 }
  0xb9   : > { %v2938_v46 = vpop.permute.xlu1 %411  ;;  %v2940_v47 = vpop.permute.xlu0 %409 }
  0xbb   : > { %1076 = vrot.lane.b32.xlu1 %v2816_v20, %s2748_s6  ;;  %1074 = vrot.lane.b32.xlu0 %v2812_v19, %s2748_s6 }
  0xbd   : > { %v2944_v48 = vpop.permute.xlu1 %418  ;;  %v2946_v49 = vpop.permute.xlu0 %416 }
  0xbf   : > { %1116 = vrot.lane.b32.xlu1 %v2824_v25, %s2749_s7  ;;  %1114 = vrot.lane.b32.xlu0 %v2820_v23, %s2749_s7 }
  0xc1   : > { %v2950_v50 = vpop.permute.xlu1 %458  ;;  %v2952_v51 = vpop.permute.xlu0 %456 }
  0xc3   : > { %1123 = vrot.lane.b32.xlu1 %v2816_v20, %s2749_s7  ;;  %1121 = vrot.lane.b32.xlu0 %v2812_v19, %s2749_s7 }
  0xc5   : > { %v2956_v52 = vpop.permute.xlu1 %465  ;;  %v2958_v53 = vpop.permute.xlu0 %463 }
  0xc7   : > { %1163 = vrot.lane.b32.xlu1 %v2824_v25, %s2750_s8  ;;  %1161 = vrot.lane.b32.xlu0 %v2820_v23, %s2750_s8 }
  0xc9   : > { %v2962_v54 = vpop.permute.xlu1 %505  ;;  %v2964_v55 = vpop.permute.xlu0 %503 }
  0xcb   : > { %1170 = vrot.lane.b32.xlu1 %v2816_v20, %s2750_s8  ;;  %1168 = vrot.lane.b32.xlu0 %v2812_v19, %s2750_s8  ;;  %s2758_s8 = smov 113  }
  0xcd   : > { %v2968_v56 = vpop.permute.xlu1 %512  ;;  %v2970_v57 = vpop.permute.xlu0 %510 }
  0xcf   : > { %1210 = vrot.lane.b32.xlu1 %v2824_v25, %s2751_s12  ;;  %1208 = vrot.lane.b32.xlu0 %v2820_v23, %s2751_s12 }
  0xd1   : > { %v2974_v58 = vpop.permute.xlu1 %552  ;;  %v2976_v59 = vpop.permute.xlu0 %550 }
  0xd3   : > { %1217 = vrot.lane.b32.xlu1 %v2816_v20, %s2751_s12  ;;  %1215 = vrot.lane.b32.xlu0 %v2812_v19, %s2751_s12 }
  0xd5   : > { %v2980_v60 = vpop.permute.xlu1 %559  ;;  %v2982_v61 = vpop.permute.xlu0 %557 }
  0xd7   : > { %1257 = vrot.lane.b32.xlu1 %v2824_v25, %s2752_s13  ;;  %1255 = vrot.lane.b32.xlu0 %v2820_v23, %s2752_s13 }
  0xd9   : > { %v2986_v62 = vpop.permute.xlu1 %599  ;;  %v2988_v63 = vpop.permute.xlu0 %597 }
  0xdb   : > { %1264 = vrot.lane.b32.xlu1 %v2816_v20, %s2752_s13  ;;  %1262 = vrot.lane.b32.xlu0 %v2812_v19, %s2752_s13  ;;  %s2764_s13 = smov 98  }
  0xdd   : > { %v2992_v1 = vpop.permute.xlu1 %606  ;;  %v2994_v2 = vpop.permute.xlu0 %604 }
  0xdf   : > { %1338 = vrot.lane.b32.xlu1 %v2824_v25, %s2753_s15  ;;  %1336 = vrot.lane.b32.xlu0 %v2820_v23, %s2753_s15 }
  0xe1   : > { %v2998_v4 = vpop.permute.xlu1 %646  ;;  %v3000_v5 = vpop.permute.xlu0 %644 }
  0xe2   : > { %4883 = vst [vmem:[#allocation2_spill] sm:$0xff] %v2998_v4  ;;  %4884 = vst [vmem:[#allocation3_spill] sm:$0xff] %v3000_v5  ;;  %v247_v5 = vmul.f32 %v240_v22, %v227_v33  ;;  %v248_v4 = vmul.f32 %v244_v24, %v226_v31  ;;  %v2556_v22 = vld [vmem:[%s4870_s0 + $0x63] ss:$8 sm:$0x3]  ;;  %v287_v24 = vrot.slane %v2555_v34, %v3004_v7 }
  0xe3   : > { %1345 = vrot.lane.b32.xlu1 %v2816_v20, %s2753_s15  ;;  %1343 = vrot.lane.b32.xlu0 %v2812_v19, %s2753_s15  ;;  %v2557_v33 = vld [vmem:[%s4870_s0 + $0x3] ss:$8 sm:$0x3]  ;;  %s2761_s15 = smov 110  }
  0xe5   : > { %v3019_v12 = vpop.permute.xlu1 %653  ;;  %v3021_v13 = vpop.permute.xlu0 %651 }
  0xe6   : > { %4885 = vst [vmem:[#allocation4_spill] sm:$0xff] %v3019_v12  ;;  %4886 = vst [vmem:[#allocation5_spill] sm:$0xff] %v3021_v13  ;;  %v201_v13 = vmul.f32 %v197_v15, %v180_v17  ;;  %v218_v12 = vmul.f32 %v214_v21, %v186_v0  ;;  %v257_v15 = vrot.slane %v2554_v27, %v3004_v7 }
  0xe7   : > { %1385 = vrot.lane.b32.xlu1 %v2824_v25, %s2754_s22  ;;  %1383 = vrot.lane.b32.xlu0 %v2820_v23, %s2754_s22  ;;  %v261_v17 = vrot.slane %v2554_v27, %v3010_v9  ;;  %v233_v21 = vsel %vm225_vm1, %v2890_v30, %v2878_v26  ;;  %v291_v0 = vrot.slane %v2555_v34, %v3010_v9  ;;  %vm977_vm1 = vcmp.lt.s32.totalorder %v3002_v6, 16 }
  0xe8   : > { %v273_v26 = vsel %vm272_vm2, %v2910_v37, %v2908_v36  ;;  %v274_v30 = vsel %vm272_vm2, %v2908_v36, %v2910_v37  ;;  %v3107_v36 = vld [vmem:[%s4870_s0 + $0x4] ss:$8 sm:$0x3] }
  0xe9   : > { %v3049_v8 = vpop.permute.xlu1 %693  ;;  %v3051_v10 = vpop.permute.xlu0 %691  ;;  %v265_v31 = vmul.f32 %v261_v17, %v232_v16  ;;  %v294_v29 = vmul.f32 %v287_v24, %v274_v30  ;;  %v295_v34 = vmul.f32 %v291_v0, %v273_v26  ;;  %v308_v17 = vrot.slane %v2556_v22, %v3010_v9  ;;  %v3134_v0 = vld [vmem:[%s4870_s0 + $0x5] ss:$8 sm:$0x3] }
  0xea   : > { %4887 = vst [vmem:[#allocation6_spill] sm:$0xff] %v3051_v10  ;;  %v220_v10 = vadd.f32 %v218_v12, %v201_v13  ;;  %v249_v12 = vadd.f32 %v247_v5, %v219_v18  ;;  %v334_v18 = vrot.slane %v2557_v33, %v3004_v7  ;;  %v338_v16 = vrot.slane %v2557_v33, %v3010_v9  ;;  %v3151_v33 = vld [vmem:[%s4870_s0 + $0x66] ss:$8 sm:$0x3] }
  0xeb   : > { %1392 = vrot.lane.b32.xlu1 %v2816_v20, %s2754_s22  ;;  %1390 = vrot.lane.b32.xlu0 %v2812_v19, %s2754_s22  ;;  %v355_v24 = vrot.slane %v3102_v11, %v3010_v9  ;;  %v279_v26 = vsel %vm272_vm2, %v2884_v28, %v2896_v32  ;;  %v280_v30 = vsel %vm272_vm2, %v2896_v32, %v2884_v28  ;;  %v3160_v28 = vld [vmem:[%s4870_s0 + $0x6] ss:$8 sm:$0x3]  ;;  %s2762_s22 = smov 109   ;;  %vm1024_vm2 = vcmp.lt.s32.totalorder %v3002_v6, 15 }
  0xec   : > { %v250_v13 = vadd.f32 %v248_v4, %v220_v10  ;;  %v264_v4 = vmul.f32 %v257_v15, %v233_v21  ;;  %v304_v10 = vrot.slane %v2556_v22, %v3004_v7  ;;  %v3113_v15 = vld [vmem:[%s4870_s0 + $0x65] ss:$8 sm:$0x3]  ;;  %v381_v22 = vrot.slane %v3107_v36, %v3004_v7 }
  0xed   : > { %v3061_v35 = vpop.permute.xlu1 %700  ;;  %v3063_v14 = vpop.permute.xlu0 %698  ;;  %v320_v32 = vsel %vm319_vm3, %v2916_v39, %v2914_v38 }
  0xee   : > { %4888 = vst [vmem:[#allocation7_spill] sm:$0xff] %v3063_v14  ;;  %v266_v37 = vadd.f32 %v264_v4, %v249_v12  ;;  %v267_v27 = vadd.f32 %v265_v31, %v250_v13  ;;  %v351_v13 = vrot.slane %v3102_v11, %v3004_v7  ;;  %v385_v4 = vrot.slane %v3107_v36, %v3010_v9 }
  0xef   : > { %1432 = vrot.lane.b32.xlu1 %v2824_v25, %s2755_s27  ;;  %1430 = vrot.lane.b32.xlu0 %v2820_v23, %s2755_s27  ;;  %v321_v36 = vsel %vm319_vm3, %v2914_v38, %v2916_v39  ;;  %v311_v31 = vmul.f32 %v304_v10, %v280_v30  ;;  %v3186_v38 = vld [vmem:[%s4870_s0 + $0x67] ss:$8 sm:$0x3]  ;;  %v326_v39 = vsel %vm319_vm3, %v2922_v41, %v2920_v40 }
  0xf0   : > { %v296_v11 = vadd.f32 %v294_v29, %v266_v37  ;;  %v428_v37 = vrot.slane %v3134_v0, %v3004_v7  ;;  %v327_v10 = vsel %vm319_vm3, %v2920_v40, %v2922_v41  ;;  %v341_v30 = vmul.f32 %v334_v18, %v321_v36 }
  0xf1   : > { %v3091_v3 = vpop.permute.xlu1 %740  ;;  %v3093_v5 = vpop.permute.xlu0 %738  ;;  %v342_v14 = vmul.f32 %v338_v16, %v320_v32  ;;  %v367_v40 = vsel %vm366_vm4, %v2928_v43, %v2926_v42  ;;  %v368_v41 = vsel %vm366_vm4, %v2926_v42, %v2928_v43  ;;  %v3228_v42 = vld [vmem:[%s4870_s0 + $0x70] ss:$8 sm:$0x3]  ;;  %v373_v43 = vsel %vm366_vm4, %v2934_v45, %v2932_v44 }
  0xf2   : > { %4889 = vst [vmem:[#allocation8_spill] sm:$0xff] %v3091_v3  ;;  %4890 = vst [vmem:[#allocation9_spill] sm:$0xff] %v3093_v5  ;;  %v312_v5 = vmul.f32 %v308_v17, %v279_v26  ;;  %v475_v17 = vrot.slane %v3160_v28, %v3004_v7  ;;  %v3203_v3 = vld [vmem:[%s4870_s0 + $0x7] ss:$8 sm:$0x3]  ;;  %v388_v32 = vmul.f32 %v381_v22, %v368_v41  ;;  %vm1071_vm3 = vcmp.lt.s32.totalorder %v3002_v6, 14 }
  0xf3   : > { %1439 = vrot.lane.b32.xlu1 %v2816_v20, %s2755_s27  ;;  %1437 = vrot.lane.b32.xlu0 %v2812_v19, %s2755_s27  ;;  %s2757_s27 = smov 114   ;;  %v389_v18 = vmul.f32 %v385_v4, %v367_v40  ;;  %v543_v22 = vrot.slane %v3228_v42, %v3010_v9  ;;  %v4893_v40 = vrot.slane %v3113_v15, %v3004_v7 }
  0xf5   : > { %v3120_v21 = vpop.permute.xlu1 %747  ;;  %v3122_v12 = vpop.permute.xlu0 %745 }
  0xf6   : > { %4891 = vst [vmem:[#allocation10_spill] sm:$0xff] %v3120_v21  ;;  %4892 = vst [vmem:[#allocation11_spill] sm:$0xff] %v3122_v12  ;;  %v297_v12 = vadd.f32 %v295_v34, %v267_v27  ;;  %v402_v21 = vrot.slane %v3113_v15, %v3010_v9  ;;  %v432_v27 = vrot.slane %v3134_v0, %v3010_v9 }
  0xf7   : > { %1479 = vrot.lane.b32.xlu1 %v2824_v25, %s2756_s18  ;;  %1477 = vrot.lane.b32.xlu0 %v2820_v23, %s2756_s18  ;;  %v313_v0 = vadd.f32 %v311_v31, %v296_v11  ;;  %v358_v31 = vmul.f32 %v351_v13, %v327_v10  ;;  %v359_v11 = vmul.f32 %v355_v24, %v326_v39 }
  0xf8   : > { %v314_v26 = vadd.f32 %v312_v5, %v297_v12  ;;  %v374_v13 = vsel %vm366_vm4, %v2932_v44, %v2934_v45  ;;  %v522_v24 = vrot.slane %v3203_v3, %v3004_v7  ;;  %v3247_v5 = vld [vmem:[%s4870_s0 + $0x10] ss:$8 sm:$0x3]  ;;  %v414_v44 = vsel %vm413_vm5, %v2940_v47, %v2938_v46 }
  0xf9   : > { %v3175_v29 = vpop.permute.xlu1 %787  ;;  %v3177_v34 = vpop.permute.xlu0 %785  ;;  %v343_v39 = vadd.f32 %v341_v30, %v313_v0  ;;  %v415_v45 = vsel %vm413_vm5, %v2938_v46, %v2940_v47  ;;  %v405_v41 = vmul.f32 %v4893_v40, %v374_v13  ;;  %v406_v36 = vmul.f32 %v402_v21, %v373_v43  ;;  %v3274_v46 = vld [vmem:[%s4870_s0 + $0x71] ss:$8 sm:$0x3] }
  0xfa   : > { %v344_v10 = vadd.f32 %v342_v14, %v314_v26  ;;  %v539_v14 = vrot.slane %v3228_v42, %v3004_v7  ;;  %v420_v47 = vsel %vm413_vm5, %v2946_v49, %v2944_v48  ;;  %v569_v15 = vrot.slane %v3247_v5, %v3004_v7 }
  0xfb   : > { %1486 = vrot.lane.b32.xlu1 %v2816_v20, %s2756_s18  ;;  %1484 = vrot.lane.b32.xlu0 %v2812_v19, %s2756_s18  ;;  %v360_v26 = vadd.f32 %v358_v31, %v343_v39  ;;  %v421_v31 = vsel %vm413_vm5, %v2944_v48, %v2946_v49  ;;  %v573_v21 = vrot.slane %v3247_v5, %v3010_v9  ;;  %vm1118_vm4 = vcmp.lt.s32.totalorder %v3002_v6, 13 }
  0xfc   : > { %v361_v30 = vadd.f32 %v359_v11, %v344_v10  ;;  %v435_v13 = vmul.f32 %v428_v37, %v415_v45  ;;  %v436_v39 = vmul.f32 %v432_v27, %v414_v44  ;;  %v3293_v10 = vld [vmem:[%s4870_s0 + $0x11] ss:$8 sm:$0x3]  ;;  %v461_v48 = vsel %vm460_vm6, %v2952_v51, %v2950_v50 }
  0xfd   : > { %v3218_v16 = vpop.permute.xlu1 %794  ;;  %v3220_v12 = vpop.permute.xlu0 %792  ;;  %v390_v11 = vadd.f32 %v388_v32, %v360_v26  ;;  %v462_v49 = vsel %vm460_vm6, %v2950_v50, %v2952_v51  ;;  %v586_v37 = vrot.slane %v3274_v46, %v3004_v7  ;;  %v590_v27 = vrot.slane %v3274_v46, %v3010_v9  ;;  %v3323_v51 = vld [vmem:[%s4870_s0 + $0x72] ss:$8 sm:$0x3] }
  0xfe   : > { %v391_v43 = vadd.f32 %v389_v18, %v361_v30  ;;  %v4894_v26 = vrot.slane %v3151_v33, %v3004_v7  ;;  %v4895_v40 = vrot.slane %v3151_v33, %v3010_v9  ;;  %v616_v33 = vrot.slane %v3293_v10, %v3004_v7 }
  0xff   : > { %1526 = vrot.lane.b32.xlu1 %v2824_v25, %s2757_s27  ;;  %1524 = vrot.lane.b32.xlu0 %v2820_v23, %s2757_s27  ;;  %v407_v44 = vadd.f32 %v405_v41, %v390_v11  ;;  %v468_v41 = vsel %vm460_vm6, %v2956_v52, %v2958_v53  ;;  %v609_v46 = vsel %vm601_vm9, %v2992_v1, %v2994_v2  ;;  %vm1165_vm5 = vcmp.lt.s32.totalorder %v3002_v6, 3 }
 0x100   : > { %v408_v45 = vadd.f32 %v406_v36, %v391_v43  ;;  %v452_v30 = vmul.f32 %v4894_v26, %v421_v31  ;;  %v453_v50 = vmul.f32 %v4895_v40, %v420_v47  ;;  %v467_v36 = vsel %vm460_vm6, %v2958_v53, %v2956_v52  ;;  %v3348_v53 = vld [vmem:[%s4870_s0 + $0x12] ss:$8 sm:$0x3] }
 0x101   : > { %v3263_v4 = vpop.permute.xlu1 %834  ;;  %v3265_v0 = vpop.permute.xlu0 %832  ;;  %v437_v31 = vadd.f32 %v435_v13, %v407_v44  ;;  %v482_v43 = vmul.f32 %v475_v17, %v462_v49  ;;  %v4896_v26 = vrot.slane %v3160_v28, %v3010_v9  ;;  %v508_v13 = vsel %vm507_vm7, %v2964_v55, %v2962_v54 }
 0x102   : > { %v438_v11 = vadd.f32 %v436_v39, %v408_v45  ;;  %v509_v17 = vsel %vm507_vm7, %v2962_v54, %v2964_v55  ;;  %v633_v28 = vrot.slane %v3323_v51, %v3004_v7  ;;  %v637_v39 = vrot.slane %v3323_v51, %v3010_v9  ;;  %v3378_v55 = vld [vmem:[%s4870_s0 + $0x73] ss:$8 sm:$0x3] }
 0x103   : > { %1533 = vrot.lane.b32.xlu1 %v2816_v20, %s2757_s27  ;;  %1531 = vrot.lane.b32.xlu0 %v2812_v19, %s2757_s27  ;;  %v483_v52 = vmul.f32 %v4896_v26, %v461_v48  ;;  %v454_v44 = vadd.f32 %v452_v30, %v437_v31  ;;  %v4897_v40 = vrot.slane %v3186_v38, %v3004_v7  ;;  %vm1212_vm6 = vcmp.lt.s32.totalorder %v3002_v6, 2 }
 0x104   : > { %v455_v45 = vadd.f32 %v453_v50, %v438_v11  ;;  %v4898_v47 = vrot.slane %v3186_v38, %v3010_v9  ;;  %v514_v30 = vsel %vm507_vm7, %v2970_v57, %v2968_v56  ;;  %v515_v50 = vsel %vm507_vm7, %v2968_v56, %v2970_v57  ;;  %v3403_v56 = vld [vmem:[%s4870_s0 + $0x13] ss:$8 sm:$0x3] }
 0x105   : > { %v3309_v18 = vpop.permute.xlu1 %841  ;;  %v3311_v32 = vpop.permute.xlu0 %839  ;;  %v499_v26 = vmul.f32 %v4897_v40, %v468_v41  ;;  %v663_v38 = vrot.slane %v3348_v53, %v3004_v7  ;;  %v484_v41 = vadd.f32 %v482_v43, %v454_v44  ;;  %v529_v31 = vmul.f32 %v522_v24, %v509_v17 }
 0x106   : > { %v500_v54 = vmul.f32 %v4898_v47, %v467_v36  ;;  %v667_v36 = vrot.slane %v3348_v53, %v3010_v9  ;;  %v485_v47 = vadd.f32 %v483_v52, %v455_v45  ;;  %v4899_v11 = vrot.slane %v3203_v3, %v3010_v9 }
 0x107   : > { %1573 = vrot.lane.b32.xlu1 %v2824_v25, %s2758_s8  ;;  %1571 = vrot.lane.b32.xlu0 %v2820_v23, %s2758_s8  ;;  %v555_v57 = vsel %vm554_vm8, %v2976_v59, %v2974_v58  ;;  %v556_v24 = vsel %vm554_vm8, %v2974_v58, %v2976_v59  ;;  %v680_v3 = vrot.slane %v3378_v55, %v3004_v7  ;;  %v3433_v59 = vld [vmem:[%s4870_s0 + $0x74] ss:$8 sm:$0x3]  ;;  %vm1259_vm7 = vcmp.lt.s32.totalorder %v3002_v6, 1 }
 0x108   : > { %v530_v40 = vmul.f32 %v4899_v11, %v508_v13  ;;  %v684_v43 = vrot.slane %v3378_v55, %v3010_v9  ;;  %v501_v17 = vadd.f32 %v499_v26, %v484_v41  ;;  %v502_v44 = vadd.f32 %v500_v54, %v485_v47 }
 0x109   : > { %v3364_v48 = vpop.permute.xlu1 %881  ;;  %v3366_v49 = vpop.permute.xlu0 %879  ;;  %v546_v45 = vmul.f32 %v539_v14, %v515_v50  ;;  %v547_v58 = vmul.f32 %v543_v22, %v514_v30  ;;  %v561_v26 = vsel %vm554_vm8, %v2982_v61, %v2980_v60  ;;  %v562_v14 = vsel %vm554_vm8, %v2980_v60, %v2982_v61  ;;  %v3458_v61 = vld [vmem:[%s4870_s0 + $0x14] ss:$8 sm:$0x3] }
 0x10a   : > { %v710_v42 = vrot.slane %v3403_v56, %v3004_v7  ;;  %v714_v22 = vrot.slane %v3403_v56, %v3010_v9  ;;  %v531_v54 = vadd.f32 %v529_v31, %v501_v17  ;;  %v532_v30 = vadd.f32 %v530_v40, %v502_v44 }
 0x10b   : > { %1580 = vrot.lane.b32.xlu1 %v2816_v20, %s2758_s8  ;;  %1578 = vrot.lane.b32.xlu0 %v2812_v19, %s2758_s8  ;;  %v576_v50 = vmul.f32 %v569_v15, %v556_v24  ;;  %v577_v60 = vmul.f32 %v573_v21, %v555_v57  ;;  %v602_v41 = vsel %vm601_vm9, %v2988_v63, %v2986_v62  ;;  %vm1340_vm8 = vcmp.lt.s32.totalorder %v3002_v6, 127  ;;  %s2772_s8 = smov 81  }
 0x10c   : > { %v603_v15 = vsel %vm601_vm9, %v2986_v62, %v2988_v63  ;;  %v727_v5 = vrot.slane %v3433_v59, %v3004_v7  ;;  %v731_v21 = vrot.slane %v3433_v59, %v3010_v9  ;;  %v548_v31 = vadd.f32 %v546_v45, %v531_v54  ;;  %v3486_v62 = vld [vmem:[%s4870_s0 + $0x75] ss:$8 sm:$0x3] }
 0x10d   : > { %v3419_v52 = vpop.permute.xlu1 %888  ;;  %v3421_v13 = vpop.permute.xlu0 %886  ;;  %v549_v11 = vadd.f32 %v547_v58, %v532_v30  ;;  %v593_v40 = vmul.f32 %v586_v37, %v562_v14  ;;  %v594_v57 = vmul.f32 %v590_v27, %v561_v26  ;;  %v608_v24 = vsel %vm601_vm9, %v2994_v2, %v2992_v1  ;;  %v3513_v1 = vld [vmem:[%s4870_s0 + $0x15] ss:$8 sm:$0x3]  ;;  %v4901_v2 = vld [vmem:[#allocation2_spill] sm:$0xff]  ;;  %v4902_v14 = vld [vmem:[#allocation3_spill] sm:$0xff] }
 0x10e   : > { %v757_v37 = vrot.slane %v3458_v61, %v3004_v7  ;;  %v761_v27 = vrot.slane %v3458_v61, %v3010_v9  ;;  %v578_v17 = vadd.f32 %v576_v50, %v548_v31  ;;  %v623_v45 = vmul.f32 %v616_v33, %v603_v15 }
 0x10f   : > { %1620 = vrot.lane.b32.xlu1 %v2824_v25, %s2759_s21  ;;  %1618 = vrot.lane.b32.xlu0 %v2820_v23, %s2759_s21  ;;  %v579_v44 = vadd.f32 %v577_v60, %v549_v11  ;;  %v4900_v58 = vrot.slane %v3293_v10, %v3010_v9  ;;  %v649_v54 = vsel %vm648_vm10, %v4902_v14, %v4901_v2  ;;  %v3541_v11 = vld [vmem:[%s4870_s0 + $0x76] ss:$8 sm:$0x3]  ;;  %vm1387_vm9 = vcmp.lt.s32.totalorder %v3002_v6, 126 }
 0x110   : > { %v650_v33 = vsel %vm648_vm10, %v4901_v2, %v4902_v14  ;;  %v774_v10 = vrot.slane %v3486_v62, %v3004_v7  ;;  %v778_v30 = vrot.slane %v3486_v62, %v3010_v9  ;;  %v595_v60 = vadd.f32 %v593_v40, %v578_v17  ;;  %v4903_v2 = vld [vmem:[#allocation4_spill] sm:$0xff]  ;;  %v4904_v40 = vld [vmem:[#allocation5_spill] sm:$0xff] }
 0x111   : > { %v3474_v47 = vpop.permute.xlu1 %928  ;;  %v3488_v63 = vpop.permute.xlu0 %926  ;;  %v624_v26 = vmul.f32 %v4900_v58, %v602_v41  ;;  %v596_v41 = vadd.f32 %v594_v57, %v579_v44  ;;  %v640_v15 = vmul.f32 %v633_v28, %v609_v46  ;;  %v641_v31 = vmul.f32 %v637_v39, %v608_v24  ;;  %v3568_v14 = vld [vmem:[%s4870_s0 + $0x16] ss:$8 sm:$0x3] }
 0x112   : > { %v655_v57 = vsel %vm648_vm10, %v4904_v40, %v4903_v2  ;;  %v656_v51 = vsel %vm648_vm10, %v4903_v2, %v4904_v40  ;;  %v804_v28 = vrot.slane %v3513_v1, %v3004_v7  ;;  %v808_v39 = vrot.slane %v3513_v1, %v3010_v9  ;;  %v4905_v2 = vld [vmem:[#allocation6_spill] sm:$0xff] }
 0x113   : > { %1627 = vrot.lane.b32.xlu1 %v2816_v20, %s2759_s21  ;;  %1625 = vrot.lane.b32.xlu0 %v2812_v19, %s2759_s21  ;;  %v625_v24 = vadd.f32 %v623_v45, %v595_v60  ;;  %v626_v46 = vadd.f32 %v624_v26, %v596_v41  ;;  %v670_v17 = vmul.f32 %v663_v38, %v650_v33  ;;  %s2765_s21 = smov 97   ;;  %vm1434_vm10 = vcmp.lt.s32.totalorder %v3002_v6, 125 }
 0x114   : > { %v671_v44 = vmul.f32 %v667_v36, %v649_v54  ;;  %v696_v45 = vsel %vm695_vm11, %v4905_v2, %v3049_v8  ;;  %v697_v38 = vsel %vm695_vm11, %v3049_v8, %v4905_v2  ;;  %v821_v53 = vrot.slane %v3541_v11, %v3004_v7  ;;  %v3596_v8 = vld [vmem:[%s4870_s0 + $0x77] ss:$8 sm:$0x3] }
 0x115   : > { %v3529_v50 = vpop.permute.xlu1 %935  ;;  %v3543_v58 = vpop.permute.xlu0 %933  ;;  %v825_v36 = vrot.slane %v3541_v11, %v3010_v9  ;;  %v642_v54 = vadd.f32 %v640_v15, %v625_v24  ;;  %v643_v33 = vadd.f32 %v641_v31, %v626_v46  ;;  %v687_v60 = vmul.f32 %v680_v3, %v656_v51  ;;  %v4906_v15 = vld [vmem:[#allocation7_spill] sm:$0xff]  ;;  %v4907_v2 = vld [vmem:[#allocation8_spill] sm:$0xff] }
 0x116   : > { %v688_v41 = vmul.f32 %v684_v43, %v655_v57  ;;  %v702_v31 = vsel %vm695_vm11, %v4906_v15, %v3061_v35  ;;  %v703_v55 = vsel %vm695_vm11, %v3061_v35, %v4906_v15  ;;  %v851_v3 = vrot.slane %v3568_v14, %v3004_v7  ;;  %v3623_v35 = vld [vmem:[%s4870_s0 + $0x17] ss:$8 sm:$0x3] }
 0x117   : > { %1667 = vrot.lane.b32.xlu1 %v2824_v25, %s2760_s30  ;;  %1665 = vrot.lane.b32.xlu0 %v2820_v23, %s2760_s30  ;;  %v855_v43 = vrot.slane %v3568_v14, %v3010_v9  ;;  %v672_v57 = vadd.f32 %v670_v17, %v642_v54  ;;  %v673_v51 = vadd.f32 %v671_v44, %v643_v33  ;;  %v4908_v15 = vld [vmem:[#allocation9_spill] sm:$0xff]  ;;  %vm1481_vm11 = vcmp.lt.s32.totalorder %v3002_v6, 115 }
 0x118   : > { %v717_v24 = vmul.f32 %v710_v42, %v697_v38  ;;  %v718_v46 = vmul.f32 %v714_v22, %v696_v45  ;;  %v743_v17 = vsel %vm742_vm12, %v4908_v15, %v4907_v2  ;;  %v744_v42 = vsel %vm742_vm12, %v4907_v2, %v4908_v15  ;;  %v3651_v2 = vld [vmem:[%s4870_s0 + $0x80] ss:$8 sm:$0x3] }
 0x119   : > { %v3584_v26 = vpop.permute.xlu1 %975  ;;  %v3598_v40 = vpop.permute.xlu0 %973  ;;  %v868_v56 = vrot.slane %v3596_v8, %v3004_v7  ;;  %v689_v45 = vadd.f32 %v687_v60, %v672_v57  ;;  %v690_v38 = vadd.f32 %v688_v41, %v673_v51  ;;  %v734_v54 = vmul.f32 %v727_v5, %v703_v55  ;;  %v4909_v22 = vld [vmem:[#allocation10_spill] sm:$0xff]  ;;  %v4910_v60 = vld [vmem:[#allocation11_spill] sm:$0xff] }
 0x11a   : > { %v735_v33 = vmul.f32 %v731_v21, %v702_v31  ;;  %v749_v41 = vsel %vm742_vm12, %v4910_v60, %v4909_v22  ;;  %v750_v59 = vsel %vm742_vm12, %v4909_v22, %v4910_v60  ;;  %v898_v5 = vrot.slane %v3623_v35, %v3004_v7  ;;  %v3677_v22 = vld [vmem:[%s4870_s0 + $0x20] ss:$8 sm:$0x3] }
 0x11b   : > { %1674 = vrot.lane.b32.xlu1 %v2816_v20, %s2760_s30  ;;  %1672 = vrot.lane.b32.xlu0 %v2812_v19, %s2760_s30  ;;  %v902_v21 = vrot.slane %v3623_v35, %v3010_v9  ;;  %v719_v31 = vadd.f32 %v717_v24, %v689_v45  ;;  %v720_v55 = vadd.f32 %v718_v46, %v690_v38  ;;  %s2766_s30 = smov 96   ;;  %vm1528_vm12 = vcmp.lt.s32.totalorder %v3002_v6, 114 }
 0x11c   : > { %v764_v57 = vmul.f32 %v757_v37, %v744_v42  ;;  %v765_v51 = vmul.f32 %v761_v27, %v743_v17  ;;  %v790_v24 = vsel %vm789_vm13, %v3177_v34, %v3175_v29  ;;  %v791_v37 = vsel %vm789_vm13, %v3175_v29, %v3177_v34  ;;  %v3703_v29 = vld [vmem:[%s4870_s0 + $0x81] ss:$8 sm:$0x3] }
 0x11d   : > { %v3639_v44 = vpop.permute.xlu1 %982  ;;  %v3653_v15 = vpop.permute.xlu0 %980  ;;  %v915_v61 = vrot.slane %v3651_v2, %v3004_v7  ;;  %v919_v27 = vrot.slane %v3651_v2, %v3010_v9  ;;  %v736_v17 = vadd.f32 %v734_v54, %v719_v31  ;;  %v737_v42 = vadd.f32 %v735_v33, %v720_v55 }
 0x11e   : > { %v781_v45 = vmul.f32 %v774_v10, %v750_v59  ;;  %v782_v38 = vmul.f32 %v778_v30, %v749_v41  ;;  %v796_v54 = vsel %vm789_vm13, %v3220_v12, %v3218_v16  ;;  %v797_v10 = vsel %vm789_vm13, %v3218_v16, %v3220_v12 }
 0x11f   : > { %1714 = vrot.lane.b32.xlu1 %v2824_v25, %s2761_s15  ;;  %1712 = vrot.lane.b32.xlu0 %v2820_v23, %s2761_s15  ;;  %v945_v62 = vrot.slane %v3677_v22, %v3004_v7  ;;  %v766_v30 = vadd.f32 %v764_v57, %v736_v17  ;;  %v767_v33 = vadd.f32 %v765_v51, %v737_v42  ;;  %vm1575_vm13 = vcmp.lt.s32.totalorder %v3002_v6, 113 }
 0x120   : > { %v811_v60 = vmul.f32 %v804_v28, %v791_v37  ;;  %v812_v41 = vmul.f32 %v808_v39, %v790_v24  ;;  %v837_v16 = vsel %vm836_vm14, %v3265_v0, %v3263_v4  ;;  %v838_v12 = vsel %vm836_vm14, %v3263_v4, %v3265_v0  ;;  %v3749_v4 = vld [vmem:[%s4870_s0 + $0x21] ss:$8 sm:$0x3] }
 0x121   : > { %v3692_v46 = vpop.permute.xlu1 %1022  ;;  %v3705_v34 = vpop.permute.xlu0 %1020  ;;  %v949_v59 = vrot.slane %v3677_v22, %v3010_v9  ;;  %v962_v28 = vrot.slane %v3703_v29, %v3004_v7  ;;  %v783_v39 = vadd.f32 %v781_v45, %v766_v30  ;;  %v784_v31 = vadd.f32 %v782_v38, %v767_v33 }
 0x122   : > { %v828_v55 = vmul.f32 %v821_v53, %v797_v10  ;;  %v829_v57 = vmul.f32 %v825_v36, %v796_v54  ;;  %v843_v51 = vsel %vm836_vm14, %v3311_v32, %v3309_v18  ;;  %v844_v53 = vsel %vm836_vm14, %v3309_v18, %v3311_v32  ;;  %v3774_v18 = vld [vmem:[%s4870_s0 + $0x82] ss:$8 sm:$0x3] }
 0x123   : > { %1721 = vrot.lane.b32.xlu1 %v2816_v20, %s2761_s15  ;;  %1719 = vrot.lane.b32.xlu0 %v2812_v19, %s2761_s15  ;;  %v966_v11 = vrot.slane %v3703_v29, %v3010_v9  ;;  %v813_v36 = vadd.f32 %v811_v60, %v783_v39  ;;  %v814_v24 = vadd.f32 %v812_v41, %v784_v31  ;;  %vm1622_vm14 = vcmp.lt.s32.totalorder %v3002_v6, 112 }
 0x124   : > { %v858_v37 = vmul.f32 %v851_v3, %v838_v12  ;;  %v859_v17 = vmul.f32 %v855_v43, %v837_v16  ;;  %v884_v32 = vsel %vm883_vm15, %v3366_v49, %v3364_v48  ;;  %v885_v3 = vsel %vm883_vm15, %v3364_v48, %v3366_v49  ;;  %v3800_v48 = vld [vmem:[%s4870_s0 + $0x22] ss:$8 sm:$0x3] }
 0x125   : > { %v3738_v1 = vpop.permute.xlu1 %1029  ;;  %v3751_v0 = vpop.permute.xlu0 %1027  ;;  %v992_v14 = vrot.slane %v3749_v4, %v3004_v7  ;;  %v996_v43 = vrot.slane %v3749_v4, %v3010_v9  ;;  %v830_v45 = vadd.f32 %v828_v55, %v813_v36  ;;  %v831_v38 = vadd.f32 %v829_v57, %v814_v24 }
 0x126   : > { %v875_v54 = vmul.f32 %v868_v56, %v844_v53  ;;  %v4911_v10 = vrot.slane %v3596_v8, %v3010_v9  ;;  %v890_v33 = vsel %vm883_vm15, %v3421_v13, %v3419_v52  ;;  %v891_v56 = vsel %vm883_vm15, %v3419_v52, %v3421_v13  ;;  %v3826_v52 = vld [vmem:[%s4870_s0 + $0x83] ss:$8 sm:$0x3] }
 0x127   : > { %1761 = vrot.lane.b32.xlu1 %v2824_v25, %s2762_s22  ;;  %1759 = vrot.lane.b32.xlu0 %v2820_v23, %s2762_s22  ;;  %v1009_v8 = vrot.slane %v3774_v18, %v3004_v7  ;;  %v1013_v60 = vrot.slane %v3774_v18, %v3010_v9  ;;  %v860_v41 = vadd.f32 %v858_v37, %v830_v45  ;;  %vm1669_vm15 = vcmp.lt.s32.totalorder %v3002_v6, 111 }
 0x128   : > { %v876_v30 = vmul.f32 %v4911_v10, %v843_v51  ;;  %v861_v16 = vadd.f32 %v859_v17, %v831_v38  ;;  %v905_v12 = vmul.f32 %v898_v5, %v885_v3  ;;  %v906_v39 = vmul.f32 %v902_v21, %v884_v32  ;;  %v3891_v3 = vld [vmem:[%s4870_s0 + $0x84] ss:$8 sm:$0x3] }
 0x129   : > { %v3789_v42 = vpop.permute.xlu1 %1069  ;;  %v3802_v49 = vpop.permute.xlu0 %1067  ;;  %v931_v13 = vsel %vm930_vm0, %v3488_v63, %v3474_v47  ;;  %v932_v5 = vsel %vm930_vm0, %v3474_v47, %v3488_v63  ;;  %v1039_v35 = vrot.slane %v3800_v48, %v3004_v7  ;;  %v877_v31 = vadd.f32 %v875_v54, %v860_v41 }
 0x12a   : > { %v878_v55 = vadd.f32 %v876_v30, %v861_v16  ;;  %v922_v57 = vmul.f32 %v915_v61, %v891_v56  ;;  %v923_v4 = vmul.f32 %v919_v27, %v890_v33  ;;  %v937_v47 = vsel %vm930_vm0, %v3543_v58, %v3529_v50  ;;  %v3909_v30 = vld [vmem:[%s4870_s0 + $0x24] ss:$8 sm:$0x3] }
 0x12b   : > { %1768 = vrot.lane.b32.xlu1 %v2816_v20, %s2762_s22  ;;  %1766 = vrot.lane.b32.xlu0 %v2812_v19, %s2762_s22  ;;  %v938_v63 = vsel %vm930_vm0, %v3529_v50, %v3543_v58  ;;  %v1043_v53 = vrot.slane %v3800_v48, %v3010_v9  ;;  %v1056_v61 = vrot.slane %v3826_v52, %v3004_v7  ;;  %v3869_v50 = vld [vmem:[%s4870_s0 + $0x23] ss:$8 sm:$0x3]  ;;  %s2774_s22 = smov 79   ;;  %vm1716_vm0 = vcmp.lt.s32.totalorder %v3002_v6, 110 }
 0x12c   : > { %v907_v2 = vadd.f32 %v905_v12, %v877_v31  ;;  %v908_v27 = vadd.f32 %v906_v39, %v878_v55  ;;  %v952_v36 = vmul.f32 %v945_v62, %v932_v5  ;;  %v953_v24 = vmul.f32 %v949_v59, %v931_v13  ;;  %v3927_v12 = vld [vmem:[%s4870_s0 + $0x85] ss:$8 sm:$0x3] }
 0x12d   : > { %v3840_v21 = vpop.permute.xlu1 %1076  ;;  %v3848_v51 = vpop.permute.xlu0 %1074  ;;  %v978_v58 = vsel %vm977_vm1, %v3598_v40, %v3584_v26  ;;  %v979_v37 = vsel %vm977_vm1, %v3584_v26, %v3598_v40  ;;  %v1060_v22 = vrot.slane %v3826_v52, %v3010_v9  ;;  %v969_v18 = vmul.f32 %v962_v28, %v938_v63 }
 0x12e   : > { %v924_v59 = vadd.f32 %v922_v57, %v907_v2  ;;  %v925_v17 = vadd.f32 %v923_v4, %v908_v27  ;;  %v970_v32 = vmul.f32 %v966_v11, %v937_v47  ;;  %v984_v40 = vsel %vm977_vm1, %v3653_v15, %v3639_v44 }
 0x12f   : > { %1808 = vrot.lane.b32.xlu1 %v2824_v25, %s2763_s29  ;;  %1806 = vrot.lane.b32.xlu0 %v2820_v23, %s2763_s29  ;;  %v985_v45 = vsel %vm977_vm1, %v3639_v44, %v3653_v15  ;;  %v1086_v29 = vrot.slane %v3869_v50, %v3004_v7  ;;  %v1090_v28 = vrot.slane %v3869_v50, %v3010_v9  ;;  %vm1763_vm1 = vcmp.lt.s32.totalorder %v3002_v6, 109 }
 0x130   : > { %v954_v11 = vadd.f32 %v952_v36, %v924_v59  ;;  %v955_v38 = vadd.f32 %v953_v24, %v925_v17  ;;  %v999_v54 = vmul.f32 %v992_v14, %v979_v37  ;;  %v1000_v10 = vmul.f32 %v996_v43, %v978_v58  ;;  %v2594_v58 = vld [vmem:[%s4870_s0 + $0x86] ss:$8 sm:$0x3] }
 0x131   : > { %v3883_v62 = vpop.permute.xlu1 %1116  ;;  %v1115_v26 = vpop.permute.xlu0 %1114  ;;  %v1025_v44 = vsel %vm1024_vm2, %v3705_v34, %v3692_v46  ;;  %v1026_v15 = vsel %vm1024_vm2, %v3692_v46, %v3705_v34  ;;  %v1103_v14 = vrot.slane %v3891_v3, %v3004_v7  ;;  %v1107_v43 = vrot.slane %v3891_v3, %v3010_v9 }
 0x132   : > { %v971_v33 = vadd.f32 %v969_v18, %v954_v11  ;;  %v972_v56 = vadd.f32 %v970_v32, %v955_v38  ;;  %v1016_v41 = vmul.f32 %v1009_v8, %v985_v45  ;;  %v1017_v16 = vmul.f32 %v1013_v60, %v984_v40  ;;  %v2595_v45 = vld [vmem:[%s4870_s0 + $0x26] ss:$8 sm:$0x3] }
 0x133   : > { %1815 = vrot.lane.b32.xlu1 %v2816_v20, %s2763_s29  ;;  %1813 = vrot.lane.b32.xlu0 %v2812_v19, %s2763_s29  ;;  %v1031_v46 = vsel %vm1024_vm2, %v3751_v0, %v3738_v1  ;;  %v1032_v34 = vsel %vm1024_vm2, %v3738_v1, %v3751_v0  ;;  %v1133_v8 = vrot.slane %v3909_v30, %v3004_v7  ;;  %vm1810_vm2 = vcmp.lt.s32.totalorder %v3002_v6, 99 }
 0x134   : > { %v1001_v60 = vadd.f32 %v999_v54, %v971_v33  ;;  %v1002_v52 = vadd.f32 %v1000_v10, %v972_v56  ;;  %v1046_v13 = vmul.f32 %v1039_v35, %v1026_v15  ;;  %v1047_v5 = vmul.f32 %v1043_v53, %v1025_v44  ;;  %v2593_v53 = vld [vmem:[%s4870_s0 + $0x25] ss:$8 sm:$0x3] }
 0x135   : > { %v1124_v48 = vpop.permute.xlu1 %1123  ;;  %v1122_v39 = vpop.permute.xlu0 %1121  ;;  %v1072_v31 = vsel %vm1071_vm3, %v3802_v49, %v3789_v42  ;;  %v1073_v1 = vsel %vm1071_vm3, %v3789_v42, %v3802_v49  ;;  %v1137_v0 = vrot.slane %v3909_v30, %v3010_v9  ;;  %v1150_v55 = vrot.slane %v3927_v12, %v3004_v7  ;;  %v2596_v30 = vld [vmem:[%s4870_s0 + $0x87] ss:$8 sm:$0x3] }
 0x136   : > { %v1018_v57 = vadd.f32 %v1016_v41, %v1001_v60  ;;  %v1019_v4 = vadd.f32 %v1017_v16, %v1002_v52  ;;  %v1063_v47 = vmul.f32 %v1056_v61, %v1032_v34  ;;  %v1064_v63 = vmul.f32 %v1060_v22, %v1031_v46 }
 0x137   : > { %1855 = vrot.lane.b32.xlu1 %v2824_v25, %s2764_s13  ;;  %1853 = vrot.lane.b32.xlu0 %v2820_v23, %s2764_s13  ;;  %v1078_v42 = vsel %vm1071_vm3, %v3848_v51, %v3840_v21  ;;  %v1079_v49 = vsel %vm1071_vm3, %v3840_v21, %v3848_v51  ;;  %v1154_v27 = vrot.slane %v3927_v12, %v3010_v9  ;;  %vm1857_vm3 = vcmp.lt.s32.totalorder %v3002_v6, 98 }
 0x138   : > { %v1048_v61 = vadd.f32 %v1046_v13, %v1018_v57  ;;  %v1049_v36 = vadd.f32 %v1047_v5, %v1019_v4  ;;  %v1093_v24 = vmul.f32 %v1086_v29, %v1073_v1  ;;  %v1094_v50 = vmul.f32 %v1090_v28, %v1072_v31  ;;  %v2597_v5 = vld [vmem:[%s4870_s0 + $0x27] ss:$8 sm:$0x3] }
 0x139   : > { %v1164_v35 = vpop.permute.xlu1 %1163  ;;  %v1162_v2 = vpop.permute.xlu0 %1161  ;;  %v1119_v21 = vsel %vm1118_vm4, %v1115_v26, %v3883_v62  ;;  %v1120_v51 = vsel %vm1118_vm4, %v3883_v62, %v1115_v26  ;;  %v1180_v37 = vrot.slane %v2593_v53, %v3004_v7  ;;  %v1184_v22 = vrot.slane %v2593_v53, %v3010_v9  ;;  %v2598_v53 = vld [vmem:[%s4870_s0 + $0x90] ss:$8 sm:$0x3] }
 0x13a   : > { %v1065_v17 = vadd.f32 %v1063_v47, %v1048_v61  ;;  %v1066_v18 = vadd.f32 %v1064_v63, %v1049_v36  ;;  %v1110_v32 = vmul.f32 %v1103_v14, %v1079_v49  ;;  %v1111_v3 = vmul.f32 %v1107_v43, %v1078_v42 }
 0x13b   : > { %1862 = vrot.lane.b32.xlu1 %v2816_v20, %s2764_s13  ;;  %1860 = vrot.lane.b32.xlu0 %v2812_v19, %s2764_s13  ;;  %v1125_v29 = vsel %vm1118_vm4, %v1122_v39, %v1124_v48  ;;  %v1126_v62 = vsel %vm1118_vm4, %v1124_v48, %v1122_v39  ;;  %v1197_v26 = vrot.slane %v2594_v58, %v3004_v7  ;;  %vm1904_vm4 = vcmp.lt.s32.totalorder %v3002_v6, 97 }
 0x13c   : > { %v1201_v28 = vrot.slane %v2594_v58, %v3010_v9  ;;  %v1095_v11 = vadd.f32 %v1093_v24, %v1065_v17  ;;  %v1096_v38 = vadd.f32 %v1094_v50, %v1066_v18  ;;  %v1140_v54 = vmul.f32 %v1133_v8, %v1120_v51 }
 0x13d   : > { %v1171_v59 = vpop.permute.xlu1 %1170  ;;  %v1169_v40 = vpop.permute.xlu0 %1168  ;;  %v1141_v10 = vmul.f32 %v1137_v0, %v1119_v21  ;;  %v1166_v44 = vsel %vm1165_vm5, %v1162_v2, %v1164_v35  ;;  %v1167_v15 = vsel %vm1165_vm5, %v1164_v35, %v1162_v2  ;;  %v1227_v43 = vrot.slane %v2595_v45, %v3004_v7  ;;  %v2599_v2 = vld [vmem:[%s4870_s0 + $0x30] ss:$8 sm:$0x3] }
 0x13e   : > { %v1112_v48 = vadd.f32 %v1110_v32, %v1095_v11  ;;  %v1113_v33 = vadd.f32 %v1111_v3, %v1096_v38  ;;  %v1157_v56 = vmul.f32 %v1150_v55, %v1126_v62  ;;  %v1158_v41 = vmul.f32 %v1154_v27, %v1125_v29  ;;  %v2600_v3 = vld [vmem:[%s4870_s0 + $0x91] ss:$8 sm:$0x3] }
 0x13f   : > { %1902 = vrot.lane.b32.xlu1 %v2824_v25, %s2765_s21  ;;  %1900 = vrot.lane.b32.xlu0 %v2820_v23, %s2765_s21  ;;  %v1172_v12 = vsel %vm1165_vm5, %v1169_v40, %v1171_v59  ;;  %v1173_v39 = vsel %vm1165_vm5, %v1171_v59, %v1169_v40  ;;  %v1231_v46 = vrot.slane %v2595_v45, %v3010_v9  ;;  %vm1951_vm5 = vcmp.lt.s32.totalorder %v3002_v6, 96 }
 0x140   : > { %v1244_v34 = vrot.slane %v2596_v30, %v3004_v7  ;;  %v1142_v8 = vadd.f32 %v1140_v54, %v1112_v48  ;;  %v1143_v60 = vadd.f32 %v1141_v10, %v1113_v33  ;;  %v1187_v52 = vmul.f32 %v1180_v37, %v1167_v15 }
 0x141   : > { %v1211_v14 = vpop.permute.xlu1 %1210  ;;  %v1209_v16 = vpop.permute.xlu0 %1208  ;;  %v1188_v13 = vmul.f32 %v1184_v22, %v1166_v44  ;;  %v1248_v55 = vrot.slane %v2596_v30, %v3010_v9  ;;  %v1204_v4 = vmul.f32 %v1197_v26, %v1173_v39  ;;  %v1205_v47 = vmul.f32 %v1201_v28, %v1172_v12 }
 0x142   : > { %v1213_v31 = vsel %vm1212_vm6, %v1209_v16, %v1211_v14  ;;  %v1214_v1 = vsel %vm1212_vm6, %v1211_v14, %v1209_v16  ;;  %v1159_v35 = vadd.f32 %v1157_v56, %v1142_v8  ;;  %v1160_v57 = vadd.f32 %v1158_v41, %v1143_v60  ;;  %v2601_v41 = vld [vmem:[%s4870_s0 + $0x31] ss:$8 sm:$0x3] }
 0x143   : > { %1909 = vrot.lane.b32.xlu1 %v2816_v20, %s2765_s21  ;;  %1907 = vrot.lane.b32.xlu0 %v2812_v19, %s2765_s21  ;;  %v1274_v27 = vrot.slane %v2597_v5, %v3004_v7  ;;  %v1278_v61 = vrot.slane %v2597_v5, %v3010_v9  ;;  %v1234_v50 = vmul.f32 %v1227_v43, %v1214_v1  ;;  %s2769_s21 = smov 93  }
 0x144   : > { %v1189_v36 = vadd.f32 %v1187_v52, %v1159_v35  ;;  %v1190_v24 = vadd.f32 %v1188_v13, %v1160_v57  ;;  %v1235_v58 = vmul.f32 %v1231_v46, %v1213_v31  ;;  %v1291_v51 = vrot.slane %v2598_v53, %v3004_v7  ;;  %v2602_v52 = vld [vmem:[%s4870_s0 + $0x92] ss:$8 sm:$0x3] }
 0x145   : > { %v1218_v0 = vpop.permute.xlu1 %1217  ;;  %v1216_v63 = vpop.permute.xlu0 %1215  ;;  %v1312_v37 = vrot.slane %v2599_v2, %v3010_v9  ;;  %v1295_v29 = vrot.slane %v2598_v53, %v3010_v9  ;;  %v1308_v62 = vrot.slane %v2599_v2, %v3004_v7  ;;  %v1325_v10 = vrot.slane %v2600_v3, %v3004_v7  ;;  %v2603_v53 = vld [vmem:[%s4870_s0 + $0x32] ss:$8 sm:$0x3] }
 0x146   : > { %v1219_v42 = vsel %vm1212_vm6, %v1216_v63, %v1218_v0  ;;  %v1220_v49 = vsel %vm1212_vm6, %v1218_v0, %v1216_v63  ;;  %v1206_v22 = vadd.f32 %v1204_v4, %v1189_v36  ;;  %v1207_v59 = vadd.f32 %v1205_v47, %v1190_v24 }
 0x147   : > { %1949 = vrot.lane.b32.xlu1 %v2824_v25, %s2766_s30  ;;  %1947 = vrot.lane.b32.xlu0 %v2820_v23, %s2766_s30  ;;  %v1251_v17 = vmul.f32 %v1244_v34, %v1220_v49  ;;  %v1252_v18 = vmul.f32 %v1248_v55, %v1219_v42  ;;  %v1329_v30 = vrot.slane %v2600_v3, %v3010_v9  ;;  %vm1998_vm6 = vcmp.lt.s32.totalorder %v3002_v6, 95 }
 0x148   : > { %v1236_v26 = vadd.f32 %v1234_v50, %v1206_v22  ;;  %v1237_v28 = vadd.f32 %v1235_v58, %v1207_v59  ;;  %v1316_v14 = vmul.f32 %v1312_v37, %v2824_v25  ;;  %v1315_v56 = vmul.f32 %v1308_v62, %v2820_v23 }
 0x149   : > { %v1258_v21 = vpop.permute.xlu1 %1257  ;;  %v1256_v32 = vpop.permute.xlu0 %1255  ;;  %v1332_v34 = vmul.f32 %v1325_v10, %v2812_v19  ;;  %v1333_v8 = vmul.f32 %v1329_v30, %v2816_v20  ;;  %v1355_v31 = vrot.slane %v2601_v41, %v3004_v7  ;;  %v1359_v1 = vrot.slane %v2601_v41, %v3010_v9 }
 0x14a   : > { %v1260_v40 = vsel %vm1259_vm7, %v1256_v32, %v1258_v21  ;;  %v1261_v45 = vsel %vm1259_vm7, %v1258_v21, %v1256_v32  ;;  %v1253_v44 = vadd.f32 %v1251_v17, %v1236_v26  ;;  %v1254_v15 = vadd.f32 %v1252_v18, %v1237_v28  ;;  %v2604_v18 = vld [vmem:[%s4870_s0 + $0x93] ss:$8 sm:$0x3] }
 0x14b   : > { %1956 = vrot.lane.b32.xlu1 %v2816_v20, %s2766_s30  ;;  %v1281_v11 = vmul.f32 %v1274_v27, %v1261_v45  ;;  %v1282_v38 = vmul.f32 %v1278_v61, %v1260_v40  ;;  %1954 = vrot.lane.b32.xlu0 %v2812_v19, %s2766_s30  ;;  %v1372_v47 = vrot.slane %v2602_v52, %v3004_v7 }
 0x14c   : > { %v1376_v63 = vrot.slane %v2602_v52, %v3010_v9  ;;  %v1402_v58 = vrot.slane %v2603_v53, %v3004_v7  ;;  %v1406_v21 = vrot.slane %v2603_v53, %v3010_v9  ;;  %v1419_v28 = vrot.slane %v2604_v18, %v3004_v7 }
 0x14d   : > { %v1265_v54 = vpop.permute.xlu1 %1264  ;;  %v1263_v43 = vpop.permute.xlu0 %1262  ;;  %v1283_v16 = vadd.f32 %v1281_v11, %v1253_v44  ;;  %v1284_v12 = vadd.f32 %v1282_v38, %v1254_v15  ;;  %v1423_v11 = vrot.slane %v2604_v18, %v3010_v9 }
 0x14e   : > { %v1266_v48 = vsel %vm1259_vm7, %v1263_v43, %v1265_v54  ;;  %v1267_v33 = vsel %vm1259_vm7, %v1265_v54, %v1263_v43  ;;  %v2605_v54 = vld [vmem:[%s4870_s0 + $0x33] ss:$8 sm:$0x3]  ;;  %vm2045_vm7 = vcmp.lt.s32.totalorder %v3002_v6, 94 }
 0x14f   : > { %1996 = vrot.lane.b32.xlu1 %v2824_v25, %s2767_s5  ;;  %v1298_v39 = vmul.f32 %v1291_v51, %v1267_v33  ;;  %v1299_v46 = vmul.f32 %v1295_v29, %v1266_v48  ;;  %1994 = vrot.lane.b32.xlu0 %v2820_v23, %s2767_s5  ;;  %v1449_v33 = vrot.slane %v2605_v54, %v3004_v7 }
 0x151   : > { %v1339_v60 = vpop.permute.xlu1 %1338  ;;  %v1300_v13 = vadd.f32 %v1298_v39, %v1283_v16  ;;  %v1301_v5 = vadd.f32 %v1299_v46, %v1284_v12  ;;  %v1337_v0 = vpop.permute.xlu0 %1336  ;;  %v2606_v16 = vld [vmem:[%s4870_s0 + $0x94] ss:$8 sm:$0x3] }
 0x152   : > { %v1341_v55 = vsel %vm1340_vm8, %v1337_v0, %v1339_v60  ;;  %v1342_v35 = vsel %vm1340_vm8, %v1339_v60, %v1337_v0 }
 0x153   : > { %2003 = vrot.lane.b32.xlu1 %v2816_v20, %s2767_s5  ;;  %v1317_v57 = vadd.f32 %v1315_v56, %v1300_v13  ;;  %v1318_v4 = vadd.f32 %v1316_v14, %v1301_v5  ;;  %2001 = vrot.lane.b32.xlu0 %v2812_v19, %s2767_s5  ;;  %v1362_v27 = vmul.f32 %v1355_v31, %v1341_v55 }
 0x154   : > { %v1363_v61 = vmul.f32 %v1359_v1, %v1342_v35  ;;  %v1453_v56 = vrot.slane %v2605_v54, %v3010_v9  ;;  %v1466_v13 = vrot.slane %v2606_v16, %v3004_v7  ;;  %v1470_v5 = vrot.slane %v2606_v16, %v3010_v9  ;;  %v2607_v1 = vld [vmem:[%s4870_s0 + $0x34] ss:$8 sm:$0x3] }
 0x155   : > { %v1346_v2 = vpop.permute.xlu1 %1345  ;;  %v1334_v42 = vadd.f32 %v1332_v34, %v1317_v57  ;;  %v1335_v49 = vadd.f32 %v1333_v8, %v1318_v4  ;;  %v1344_v36 = vpop.permute.xlu0 %1343  ;;  %v1496_v53 = vrot.slane %v2607_v1, %v3004_v7 }
 0x156   : > { %v1347_v24 = vsel %vm1340_vm8, %v1344_v36, %v1346_v2  ;;  %v1348_v50 = vsel %vm1340_vm8, %v1346_v2, %v1344_v36  ;;  %v1500_v2 = vrot.slane %v2607_v1, %v3010_v9  ;;  %vm2092_vm8 = vcmp.lt.s32.totalorder %v3002_v6, 93 }
 0x157   : > { %2043 = vrot.lane.b32.xlu1 %v2824_v25, %s2768_s16  ;;  %v1364_v51 = vadd.f32 %v1362_v27, %v1334_v42  ;;  %v1365_v37 = vadd.f32 %v1363_v61, %v1335_v49  ;;  %v1379_v22 = vmul.f32 %v1372_v47, %v1347_v24  ;;  %v1380_v59 = vmul.f32 %v1376_v63, %v1348_v50  ;;  %v2608_v49 = vld [vmem:[%s4870_s0 + $0x95] ss:$8 sm:$0x3] }
 0x158   : > { %2041 = vrot.lane.b32.xlu0 %v2820_v23, %s2768_s16 }
 0x159   : > { %v1386_v17 = vpop.permute.xlu1 %1385  ;;  %v1381_v32 = vadd.f32 %v1379_v22, %v1364_v51  ;;  %v1382_v3 = vadd.f32 %v1380_v59, %v1365_v37  ;;  %v1384_v40 = vpop.permute.xlu0 %1383  ;;  %v1513_v51 = vrot.slane %v2608_v49, %v3004_v7  ;;  %v1517_v37 = vrot.slane %v2608_v49, %v3010_v9  ;;  %v2609_v59 = vld [vmem:[%s4870_s0 + $0x35] ss:$8 sm:$0x3] }
 0x15a   : > { %v1388_v45 = vsel %vm1387_vm9, %v1384_v40, %v1386_v17  ;;  %v1389_v29 = vsel %vm1387_vm9, %v1386_v17, %v1384_v40 }
 0x15b   : > { %2050 = vrot.lane.b32.xlu1 %v2816_v20, %s2768_s16  ;;  %v1409_v62 = vmul.f32 %v1402_v58, %v1388_v45  ;;  %v1410_v26 = vmul.f32 %v1406_v21, %v1389_v29 }
 0x15c   : > { %2048 = vrot.lane.b32.xlu0 %v2812_v19, %s2768_s16 }
 0x15d   : > { %v1393_v38 = vpop.permute.xlu1 %1392  ;;  %v1411_v10 = vadd.f32 %v1409_v62, %v1381_v32  ;;  %v1412_v30 = vadd.f32 %v1410_v26, %v1382_v3  ;;  %v1391_v44 = vpop.permute.xlu0 %1390  ;;  %v1543_v62 = vrot.slane %v2609_v59, %v3004_v7  ;;  %v1547_v26 = vrot.slane %v2609_v59, %v3010_v9 }
 0x15e   : > { %v1394_v15 = vsel %vm1387_vm9, %v1391_v44, %v1393_v38  ;;  %v1395_v14 = vsel %vm1387_vm9, %v1393_v38, %v1391_v44  ;;  %vm2139_vm9 = vcmp.lt.s32.totalorder %v3002_v6, 83 }
 0x15f   : > { %2090 = vrot.lane.b32.xlu1 %v2824_v25, %s2769_s21  ;;  %v1426_v43 = vmul.f32 %v1419_v28, %v1394_v15  ;;  %v1427_v48 = vmul.f32 %v1423_v11, %v1395_v14  ;;  %v2610_v11 = vld [vmem:[%s4870_s0 + $0x96] ss:$8 sm:$0x3] }
 0x160   : > { %2088 = vrot.lane.b32.xlu0 %v2820_v23, %s2769_s21 }
 0x161   : > { %v1433_v41 = vpop.permute.xlu1 %1432  ;;  %v1428_v12 = vadd.f32 %v1426_v43, %v1411_v10  ;;  %v1429_v39 = vadd.f32 %v1427_v48, %v1412_v30  ;;  %v1431_v46 = vpop.permute.xlu0 %1430  ;;  %v1560_v43 = vrot.slane %v2610_v11, %v3004_v7  ;;  %v1564_v48 = vrot.slane %v2610_v11, %v3010_v9 }
 0x162   : > { %v1435_v34 = vsel %vm1434_vm10, %v1431_v46, %v1433_v41  ;;  %v1436_v8 = vsel %vm1434_vm10, %v1433_v41, %v1431_v46 }
 0x163   : > { %2097 = vrot.lane.b32.xlu1 %v2816_v20, %s2769_s21  ;;  %v1456_v60 = vmul.f32 %v1449_v33, %v1435_v34  ;;  %v1457_v52 = vmul.f32 %v1453_v56, %v1436_v8  ;;  %v2611_v56 = vld [vmem:[%s4870_s0 + $0x36] ss:$8 sm:$0x3] }
 0x164   : > { %2095 = vrot.lane.b32.xlu0 %v2812_v19, %s2769_s21  ;;  %s143_s21 = scalar_lea.vmem %s4872_s2, %s2653_s11 }
 0x165   : > { %v1440_v31 = vpop.permute.xlu1 %1439  ;;  %v1458_v0 = vadd.f32 %v1456_v60, %v1428_v12  ;;  %v1459_v55 = vadd.f32 %v1457_v52, %v1429_v39  ;;  %v1438_v35 = vpop.permute.xlu0 %1437  ;;  %v1590_v60 = vrot.slane %v2611_v56, %v3004_v7  ;;  %v1594_v52 = vrot.slane %v2611_v56, %v3010_v9 }
 0x166   : > { %v1441_v57 = vsel %vm1434_vm10, %v1438_v35, %v1440_v31  ;;  %v1442_v4 = vsel %vm1434_vm10, %v1440_v31, %v1438_v35  ;;  %vm2186_vm10 = vcmp.lt.s32.totalorder %v3002_v6, 82 }
 0x167   : > { %2137 = vrot.lane.b32.xlu1 %v2824_v25, %s2770_s26  ;;  %v1473_v47 = vmul.f32 %v1466_v13, %v1441_v57  ;;  %v1474_v63 = vmul.f32 %v1470_v5, %v1442_v4  ;;  %v2612_v5 = vld [vmem:[%s4870_s0 + $0x97] ss:$8 sm:$0x3] }
 0x168   : > { %2135 = vrot.lane.b32.xlu0 %v2820_v23, %s2770_s26 }
 0x169   : > { %v1480_v42 = vpop.permute.xlu1 %1479  ;;  %v1475_v27 = vadd.f32 %v1473_v47, %v1458_v0  ;;  %v1476_v61 = vadd.f32 %v1474_v63, %v1459_v55  ;;  %v1478_v36 = vpop.permute.xlu0 %1477  ;;  %v1607_v47 = vrot.slane %v2612_v5, %v3004_v7  ;;  %v1611_v63 = vrot.slane %v2612_v5, %v3010_v9 }
 0x16a   : > { %v1482_v24 = vsel %vm1481_vm11, %v1478_v36, %v1480_v42  ;;  %v1483_v50 = vsel %vm1481_vm11, %v1480_v42, %v1478_v36 }
 0x16b   : > { %2144 = vrot.lane.b32.xlu1 %v2816_v20, %s2770_s26  ;;  %v1503_v58 = vmul.f32 %v1496_v53, %v1482_v24  ;;  %v1504_v21 = vmul.f32 %v1500_v2, %v1483_v50  ;;  %v2613_v2 = vld [vmem:[%s4870_s0 + $0x37] ss:$8 sm:$0x3] }
 0x16c   : > { %2142 = vrot.lane.b32.xlu0 %v2812_v19, %s2770_s26  ;;  %s2776_s26 = smov 77  }
 0x16d   : > { %v1487_v22 = vpop.permute.xlu1 %1486  ;;  %v1505_v17 = vadd.f32 %v1503_v58, %v1475_v27  ;;  %v1506_v18 = vadd.f32 %v1504_v21, %v1476_v61  ;;  %v1485_v32 = vpop.permute.xlu0 %1484  ;;  %v1637_v58 = vrot.slane %v2613_v2, %v3004_v7  ;;  %v1641_v21 = vrot.slane %v2613_v2, %v3010_v9 }
 0x16e   : > { %v1488_v3 = vsel %vm1481_vm11, %v1485_v32, %v1487_v22  ;;  %v1489_v40 = vsel %vm1481_vm11, %v1487_v22, %v1485_v32  ;;  %vm2233_vm11 = vcmp.lt.s32.totalorder %v3002_v6, 81 }
 0x16f   : > { %2184 = vrot.lane.b32.xlu1 %v2824_v25, %s2771_s3  ;;  %v1520_v45 = vmul.f32 %v1513_v51, %v1488_v3  ;;  %v1521_v29 = vmul.f32 %v1517_v37, %v1489_v40  ;;  %v2614_v37 = vld [vmem:[%s4870_s0 + $0xa0] ss:$8 sm:$0x3] }
 0x170   : > { %2182 = vrot.lane.b32.xlu0 %v2820_v23, %s2771_s3 }
 0x171   : > { %v1527_v28 = vpop.permute.xlu1 %1526  ;;  %v1522_v38 = vadd.f32 %v1520_v45, %v1505_v17  ;;  %v1523_v54 = vadd.f32 %v1521_v29, %v1506_v18  ;;  %v1525_v10 = vpop.permute.xlu0 %1524  ;;  %v1654_v45 = vrot.slane %v2614_v37, %v3004_v7  ;;  %v1658_v29 = vrot.slane %v2614_v37, %v3010_v9 }
 0x172   : > { %v1529_v30 = vsel %vm1528_vm12, %v1525_v10, %v1527_v28  ;;  %v1530_v44 = vsel %vm1528_vm12, %v1527_v28, %v1525_v10 }
 0x173   : > { %2191 = vrot.lane.b32.xlu1 %v2816_v20, %s2771_s3  ;;  %v1550_v15 = vmul.f32 %v1543_v62, %v1529_v30  ;;  %v1551_v14 = vmul.f32 %v1547_v26, %v1530_v44  ;;  %v2615_v26 = vld [vmem:[%s4870_s0 + $0x40] ss:$8 sm:$0x3] }
 0x174   : > { %2189 = vrot.lane.b32.xlu0 %v2812_v19, %s2771_s3 }
 0x175   : > { %v1534_v33 = vpop.permute.xlu1 %1533  ;;  %v1552_v41 = vadd.f32 %v1550_v15, %v1522_v38  ;;  %v1553_v16 = vadd.f32 %v1551_v14, %v1523_v54  ;;  %v1532_v12 = vpop.permute.xlu0 %1531  ;;  %v1684_v15 = vrot.slane %v2615_v26, %v3004_v7  ;;  %v1688_v14 = vrot.slane %v2615_v26, %v3010_v9  ;;  %v2619_v26 = vld [vmem:[%s4870_s0 + $0x42] ss:$8 sm:$0x3] }
 0x176   : > { %v1535_v39 = vsel %vm1528_vm12, %v1532_v12, %v1534_v33  ;;  %v1536_v46 = vsel %vm1528_vm12, %v1534_v33, %v1532_v12  ;;  %vm2280_vm12 = vcmp.lt.s32.totalorder %v3002_v6, 80 }
 0x177   : > { %2231 = vrot.lane.b32.xlu1 %v2824_v25, %s2772_s8  ;;  %v1567_v34 = vmul.f32 %v1560_v43, %v1535_v39  ;;  %v1568_v8 = vmul.f32 %v1564_v48, %v1536_v46  ;;  %v2616_v48 = vld [vmem:[%s4870_s0 + $0xa1] ss:$8 sm:$0x3] }
 0x178   : > { %2229 = vrot.lane.b32.xlu0 %v2820_v23, %s2772_s8 }
 0x179   : > { %v1574_v13 = vpop.permute.xlu1 %1573  ;;  %v1569_v31 = vadd.f32 %v1567_v34, %v1552_v41  ;;  %v1570_v1 = vadd.f32 %v1568_v8, %v1553_v16  ;;  %v1572_v0 = vpop.permute.xlu0 %1571  ;;  %v1701_v34 = vrot.slane %v2616_v48, %v3004_v7  ;;  %v1705_v8 = vrot.slane %v2616_v48, %v3010_v9 }
 0x17a   : > { %v1576_v55 = vsel %vm1575_vm13, %v1572_v0, %v1574_v13  ;;  %v1577_v35 = vsel %vm1575_vm13, %v1574_v13, %v1572_v0 }
 0x17b   : > { %2238 = vrot.lane.b32.xlu1 %v2816_v20, %s2772_s8  ;;  %v1597_v57 = vmul.f32 %v1590_v60, %v1576_v55  ;;  %v1598_v4 = vmul.f32 %v1594_v52, %v1577_v35 }
 0x17c   : > { %2236 = vrot.lane.b32.xlu0 %v2812_v19, %s2772_s8 }
 0x17d   : > { %v1581_v53 = vpop.permute.xlu1 %1580  ;;  %v1599_v42 = vadd.f32 %v1597_v57, %v1569_v31  ;;  %v1600_v49 = vadd.f32 %v1598_v4, %v1570_v1  ;;  %v1579_v27 = vpop.permute.xlu0 %1578 }
 0x17e   : > { %v1582_v61 = vsel %vm1575_vm13, %v1579_v27, %v1581_v53  ;;  %v1583_v36 = vsel %vm1575_vm13, %v1581_v53, %v1579_v27  ;;  %vm2327_vm13 = vcmp.lt.s32.totalorder %v3002_v6, 79 }
 0x17f   : > { %2278 = vrot.lane.b32.xlu1 %v2824_v25, %s2773_s17  ;;  %v1614_v24 = vmul.f32 %v1607_v47, %v1582_v61  ;;  %v1615_v50 = vmul.f32 %v1611_v63, %v1583_v36 }
 0x180   : > { %2276 = vrot.lane.b32.xlu0 %v2820_v23, %s2773_s17 }
 0x181   : > { %v1621_v51 = vpop.permute.xlu1 %1620  ;;  %v1616_v22 = vadd.f32 %v1614_v24, %v1599_v42  ;;  %v1617_v59 = vadd.f32 %v1615_v50, %v1600_v49  ;;  %v1619_v17 = vpop.permute.xlu0 %1618 }
 0x182   : > { %v1623_v18 = vsel %vm1622_vm14, %v1619_v17, %v1621_v51  ;;  %v1624_v32 = vsel %vm1622_vm14, %v1621_v51, %v1619_v17 }
 0x183   : > { %2285 = vrot.lane.b32.xlu1 %v2816_v20, %s2773_s17  ;;  %v1644_v3 = vmul.f32 %v1637_v58, %v1623_v18  ;;  %v1645_v40 = vmul.f32 %v1641_v21, %v1624_v32 }
 0x184   : > { %2283 = vrot.lane.b32.xlu0 %v2812_v19, %s2773_s17 }
 0x185   : > { %v1628_v62 = vpop.permute.xlu1 %1627  ;;  %v1646_v28 = vadd.f32 %v1644_v3, %v1616_v22  ;;  %v1647_v11 = vadd.f32 %v1645_v40, %v1617_v59  ;;  %v1626_v38 = vpop.permute.xlu0 %1625 }
 0x186   : > { %v1629_v54 = vsel %vm1622_vm14, %v1626_v38, %v1628_v62  ;;  %v1630_v10 = vsel %vm1622_vm14, %v1628_v62, %v1626_v38  ;;  %v2618_v62 = vld [vmem:[%s4870_s0 + $0xa2] ss:$8 sm:$0x3]  ;;  %vm2374_vm14 = vcmp.lt.s32.totalorder %v3002_v6, 78 }
 0x187   : > { %2325 = vrot.lane.b32.xlu1 %v2824_v25, %s2774_s22  ;;  %v1661_v30 = vmul.f32 %v1654_v45, %v1629_v54  ;;  %v1662_v44 = vmul.f32 %v1658_v29, %v1630_v10  ;;  %v2617_v29 = vld [vmem:[%s4870_s0 + $0x41] ss:$8 sm:$0x3] }
 0x188   : > { %2323 = vrot.lane.b32.xlu0 %v2820_v23, %s2774_s22  ;;  %v1731_v54 = vrot.slane %v2617_v29, %v3004_v7  ;;  %v1735_v10 = vrot.slane %v2617_v29, %v3010_v9 }
 0x189   : > { %v1668_v43 = vpop.permute.xlu1 %1667  ;;  %v1663_v33 = vadd.f32 %v1661_v30, %v1646_v28  ;;  %v1664_v56 = vadd.f32 %v1662_v44, %v1647_v11  ;;  %v1666_v41 = vpop.permute.xlu0 %1665  ;;  %v2620_v11 = vld [vmem:[%s4870_s0 + $0xa3] ss:$8 sm:$0x3]  ;;  %v1748_v44 = vrot.slane %v2618_v62, %v3004_v7 }
 0x18a   : > { %v1670_v16 = vsel %vm1669_vm15, %v1666_v41, %v1668_v43  ;;  %v1671_v12 = vsel %vm1669_vm15, %v1668_v43, %v1666_v41  ;;  %v4321_v30 = vld [vmem:[%s4870_s0 + $0x43] ss:$8 sm:$0x3]  ;;  %v4330_v43 = vld [vmem:[%s4870_s0 + $0xa4] ss:$8 sm:$0x3]  ;;  %v1795_v41 = vrot.slane %v2620_v11, %v3004_v7 }
 0x18b   : > { %2332 = vrot.lane.b32.xlu1 %v2816_v20, %s2774_s22  ;;  %v1691_v39 = vmul.f32 %v1684_v15, %v1670_v16  ;;  %v1692_v46 = vmul.f32 %v1688_v14, %v1671_v12  ;;  %v1752_v15 = vrot.slane %v2618_v62, %v3010_v9  ;;  %v1778_v14 = vrot.slane %v2619_v26, %v3004_v7  ;;  %v4341_v16 = vld [vmem:[%s4870_s0 + $0x44] ss:$8 sm:$0x3] }
 0x18c   : > { %2330 = vrot.lane.b32.xlu0 %v2812_v19, %s2774_s22 }
 0x18d   : > { %v1675_v60 = vpop.permute.xlu1 %1674  ;;  %v1693_v52 = vadd.f32 %v1691_v39, %v1663_v33  ;;  %v1694_v13 = vadd.f32 %v1692_v46, %v1664_v56  ;;  %v1673_v5 = vpop.permute.xlu0 %1672  ;;  %v1782_v56 = vrot.slane %v2619_v26, %v3010_v9  ;;  %v1799_v39 = vrot.slane %v2620_v11, %v3010_v9 }
 0x18e   : > { %v1676_v31 = vsel %vm1669_vm15, %v1673_v5, %v1675_v60  ;;  %v1677_v1 = vsel %vm1669_vm15, %v1675_v60, %v1673_v5  ;;  %v1825_v46 = vrot.slane %v4321_v30, %v3004_v7  ;;  %v1842_v5 = vrot.slane %v4330_v43, %v3004_v7 }
 0x18f   : > { %2372 = vrot.lane.b32.xlu1 %v2824_v25, %s2775_s25  ;;  %v1708_v0 = vmul.f32 %v1701_v34, %v1676_v31  ;;  %v1709_v55 = vmul.f32 %v1705_v8, %v1677_v1  ;;  %v1829_v34 = vrot.slane %v4321_v30, %v3010_v9  ;;  %v4354_v8 = vld [vmem:[%s4870_s0 + $0xa5] ss:$8 sm:$0x3]  ;;  %v1846_v31 = vrot.slane %v4330_v43, %v3010_v9 }
 0x190   : > { %2370 = vrot.lane.b32.xlu0 %v2820_v23, %s2775_s25  ;;  %v1889_v29 = vrot.slane %v4354_v8, %v3004_v7  ;;  %vm2421_vm15 = vcmp.lt.s32.totalorder %v3002_v6, 77 }
 0x191   : > { %v1715_v35 = vpop.permute.xlu1 %1714  ;;  %v4241_v57 = vadd.f32 %v1708_v0, %v1693_v52  ;;  %v4243_v4 = vadd.f32 %v1709_v55, %v1694_v13  ;;  %v1713_v47 = vpop.permute.xlu0 %1712  ;;  %v1872_v55 = vrot.slane %v4341_v16, %v3004_v7 }
 0x192   : > { %v1717_v48 = vsel %vm1716_vm0, %v1713_v47, %v1715_v35  ;;  %v1718_v33 = vsel %vm1716_vm0, %v1715_v35, %v1713_v47  ;;  %v4372_v35 = vld [vmem:[%s4870_s0 + $0x45] ss:$8 sm:$0x3] }
 0x193   : > { %2379 = vrot.lane.b32.xlu1 %v2816_v20, %s2775_s25  ;;  %v1738_v1 = vmul.f32 %v1731_v54, %v1717_v48  ;;  %v1739_v0 = vmul.f32 %v1735_v10, %v1718_v33  ;;  %v1893_v54 = vrot.slane %v4354_v8, %v3010_v9  ;;  %v4394_v10 = vld [vmem:[%s4870_s0 + $0xa6] ss:$8 sm:$0x3] }
 0x194   : > { %2377 = vrot.lane.b32.xlu0 %v2812_v19, %s2775_s25 }
 0x195   : > { %v1722_v63 = vpop.permute.xlu1 %1721  ;;  %v1720_v53 = vpop.permute.xlu0 %1719  ;;  %v1740_v43 = vadd.f32 %v1738_v1, %v4241_v57  ;;  %v1741_v48 = vadd.f32 %v1739_v0, %v4243_v4  ;;  %v1936_v57 = vrot.slane %v4394_v10, %v3004_v7  ;;  %v1940_v4 = vrot.slane %v4394_v10, %v3010_v9 }
 0x196   : > { %v1723_v52 = vsel %vm1716_vm0, %v1720_v53, %v1722_v63  ;;  %v1724_v13 = vsel %vm1716_vm0, %v1722_v63, %v1720_v53  ;;  %v1876_v53 = vrot.slane %v4341_v16, %v3010_v9 }
 0x197   : > { %2419 = vrot.lane.b32.xlu1 %v2824_v25, %s2776_s26  ;;  %v1755_v26 = vmul.f32 %v1748_v44, %v1723_v52  ;;  %v1756_v11 = vmul.f32 %v1752_v15, %v1724_v13  ;;  %v1919_v44 = vrot.slane %v4372_v35, %v3004_v7  ;;  %v1923_v15 = vrot.slane %v4372_v35, %v3010_v9  ;;  %v4415_v52 = vld [vmem:[%s4870_s0 + $0x46] ss:$8 sm:$0x3] }
 0x198   : > { %2417 = vrot.lane.b32.xlu0 %v2820_v23, %s2776_s26 }
 0x199   : > { %v4249_v2 = vpop.permute.xlu1 %1761  ;;  %v4251_v42 = vpop.permute.xlu0 %1759  ;;  %v1758_v13 = vadd.f32 %v1756_v11, %v1741_v48 }
 0x19a   : > { %v1764_v47 = vsel %vm1763_vm1, %v4251_v42, %v4249_v2  ;;  %v1765_v63 = vsel %vm1763_vm1, %v4249_v2, %v4251_v42 }
 0x19b   : > { %2426 = vrot.lane.b32.xlu1 %v2816_v20, %s2776_s26  ;;  %v1785_v33 = vmul.f32 %v1778_v14, %v1764_v47  ;;  %v1786_v16 = vmul.f32 %v1782_v56, %v1765_v63  ;;  %v1757_v56 = vadd.f32 %v1755_v26, %v1740_v43  ;;  %v4435_v47 = vld [vmem:[%s4870_s0 + $0xa7] ss:$8 sm:$0x3]  ;;  %v1970_v63 = vrot.slane %v4415_v52, %v3010_v9 }
 0x19c   : > { %2424 = vrot.lane.b32.xlu0 %v2812_v19, %s2776_s26  ;;  %v4454_v43 = vld [vmem:[%s4870_s0 + $0x47] ss:$8 sm:$0x3]  ;;  %v1983_v48 = vrot.slane %v4435_v47, %v3004_v7 }
 0x19d   : > { %v4255_v49 = vpop.permute.xlu1 %1768  ;;  %v4257_v27 = vpop.permute.xlu0 %1766  ;;  %v1787_v26 = vadd.f32 %v1785_v33, %v1757_v56  ;;  %v1788_v11 = vadd.f32 %v1786_v16, %v1758_v13  ;;  %v4474_v56 = vld [vmem:[%s4870_s0 + $0xb0] ss:$8 sm:$0x3]  ;;  %v2017_v13 = vrot.slane %v4454_v43, %v3010_v9 }
 0x19e   : > { %v1770_v42 = vsel %vm1763_vm1, %v4257_v27, %v4255_v49  ;;  %v1771_v30 = vsel %vm1763_vm1, %v4255_v49, %v4257_v27 }
 0x19f   : > { %v1802_v1 = vmul.f32 %v1795_v41, %v1770_v42  ;;  %v1803_v0 = vmul.f32 %v1799_v39, %v1771_v30  ;;  %v1966_v39 = vrot.slane %v4415_v52, %v3004_v7 }
 0x1a1   : > { %v4259_v61 = vpop.permute.xlu1 %1808  ;;  %v4261_v36 = vpop.permute.xlu0 %1806  ;;  %v1804_v33 = vadd.f32 %v1802_v1, %v1787_v26  ;;  %v1805_v16 = vadd.f32 %v1803_v0, %v1788_v11  ;;  %v4493_v26 = vld [vmem:[%s4870_s0 + $0x50] ss:$8 sm:$0x3]  ;;  %v2030_v11 = vrot.slane %v4474_v56, %v3004_v7 }
 0x1a2   : > { %v1811_v49 = vsel %vm1810_vm2, %v4261_v36, %v4259_v61  ;;  %v1812_v27 = vsel %vm1810_vm2, %v4259_v61, %v4261_v36 }
 0x1a3   : > { %v1832_v42 = vmul.f32 %v1825_v46, %v1811_v49  ;;  %v1833_v30 = vmul.f32 %v1829_v34, %v1812_v27  ;;  %v1987_v46 = vrot.slane %v4435_v47, %v3010_v9 }
 0x1a5   : > { %v4263_v24 = vpop.permute.xlu1 %1815  ;;  %v4265_v25 = vpop.permute.xlu0 %1813  ;;  %v1834_v1 = vadd.f32 %v1832_v42, %v1804_v33  ;;  %v1835_v0 = vadd.f32 %v1833_v30, %v1805_v16 }
 0x1a6   : > { %v1817_v36 = vsel %vm1810_vm2, %v4265_v25, %v4263_v24  ;;  %v1818_v41 = vsel %vm1810_vm2, %v4263_v24, %v4265_v25 }
 0x1a7   : > { %v1849_v49 = vmul.f32 %v1842_v5, %v1817_v36  ;;  %v1850_v27 = vmul.f32 %v1846_v31, %v1818_v41  ;;  %v2013_v31 = vrot.slane %v4454_v43, %v3004_v7 }
 0x1a9   : > { %v4267_v23 = vpop.permute.xlu1 %1855  ;;  %v4269_v50 = vpop.permute.xlu0 %1853  ;;  %v1851_v42 = vadd.f32 %v1849_v49, %v1834_v1  ;;  %v1852_v30 = vadd.f32 %v1850_v27, %v1835_v0 }
 0x1aa   : > { %v1858_v24 = vsel %vm1857_vm3, %v4269_v50, %v4267_v23  ;;  %v1859_v25 = vsel %vm1857_vm3, %v4267_v23, %v4269_v50 }
 0x1ab   : > { %v1879_v36 = vmul.f32 %v1872_v55, %v1858_v24  ;;  %v1880_v41 = vmul.f32 %v1876_v53, %v1859_v25  ;;  %v2034_v55 = vrot.slane %v4474_v56, %v3010_v9 }
 0x1ad   : > { %v4271_v58 = vpop.permute.xlu1 %1862  ;;  %v4273_v20 = vpop.permute.xlu0 %1860  ;;  %v1881_v16 = vadd.f32 %v1879_v36, %v1851_v42  ;;  %v1882_v49 = vadd.f32 %v1880_v41, %v1852_v30 }
 0x1ae   : > { %v1864_v50 = vsel %vm1857_vm3, %v4273_v20, %v4271_v58  ;;  %v1865_v5 = vsel %vm1857_vm3, %v4271_v58, %v4273_v20 }
 0x1af   : > { %v1896_v24 = vmul.f32 %v1889_v29, %v1864_v50  ;;  %v1897_v25 = vmul.f32 %v1893_v54, %v1865_v5  ;;  %v2060_v29 = vrot.slane %v4493_v26, %v3004_v7  ;;  %v2064_v54 = vrot.slane %v4493_v26, %v3010_v9 }
 0x1b1   : > { %v4275_v19 = vpop.permute.xlu1 %1902  ;;  %v4277_v21 = vpop.permute.xlu0 %1900  ;;  %v1898_v1 = vadd.f32 %v1896_v24, %v1881_v16  ;;  %v1899_v0 = vadd.f32 %v1897_v25, %v1882_v49 }
 0x1b2   : > { %v1905_v58 = vsel %vm1904_vm4, %v4277_v21, %v4275_v19  ;;  %v1906_v20 = vsel %vm1904_vm4, %v4275_v19, %v4277_v21  ;;  %v4519_v19 = vld [vmem:[%s4870_s0 + $0xb1] ss:$8 sm:$0x3] }
 0x1b3   : > { %v1926_v27 = vmul.f32 %v1919_v44, %v1905_v58  ;;  %v1927_v50 = vmul.f32 %v1923_v15, %v1906_v20  ;;  %v2077_v44 = vrot.slane %v4519_v19, %v3004_v7  ;;  %v2081_v35 = vrot.slane %v4519_v19, %v3010_v9 }
 0x1b5   : > { %v4279_v51 = vpop.permute.xlu1 %1909  ;;  %v4281_v37 = vpop.permute.xlu0 %1907  ;;  %v1929_v20 = vadd.f32 %v1927_v50, %v1899_v0 }
 0x1b6   : > { %v1911_v33 = vsel %vm1904_vm4, %v4281_v37, %v4279_v51  ;;  %v1912_v8 = vsel %vm1904_vm4, %v4279_v51, %v4281_v37  ;;  %v4544_v51 = vld [vmem:[%s4870_s0 + $0x51] ss:$8 sm:$0x3] }
 0x1b7   : > { %v1943_v36 = vmul.f32 %v1936_v57, %v1911_v33  ;;  %v1944_v41 = vmul.f32 %v1940_v4, %v1912_v8  ;;  %v2107_v10 = vrot.slane %v4544_v51, %v3004_v7  ;;  %v1928_v4 = vadd.f32 %v1926_v27, %v1898_v1 }
 0x1b8   : > { %v2111_v24 = vrot.slane %v4544_v51, %v3010_v9  ;;  %v4637_v51 = vld [vmem:[%s4870_s0 + $0xb3] ss:$8 sm:$0x3] }
 0x1b9   : > { %v4283_v22 = vpop.permute.xlu1 %1949  ;;  %v4285_v59 = vpop.permute.xlu0 %1947  ;;  %v1945_v52 = vadd.f32 %v1943_v36, %v1928_v4  ;;  %v2171_v56 = vrot.slane %v4637_v51, %v3004_v7 }
 0x1ba   : > { %v1952_v37 = vsel %vm1951_vm5, %v4285_v59, %v4283_v22  ;;  %v1953_v5 = vsel %vm1951_vm5, %v4283_v22, %v4285_v59  ;;  %v4569_v22 = vld [vmem:[%s4870_s0 + $0xb2] ss:$8 sm:$0x3] }
 0x1bb   : > { %v1973_v42 = vmul.f32 %v1966_v39, %v1952_v37  ;;  %v1974_v30 = vmul.f32 %v1970_v63, %v1953_v5  ;;  %v2124_v39 = vrot.slane %v4569_v22, %v3004_v7  ;;  %v1946_v63 = vadd.f32 %v1944_v41, %v1929_v20 }
 0x1bc   : > { %v2128_v47 = vrot.slane %v4569_v22, %v3010_v9 }
 0x1bd   : > { %v4287_v17 = vpop.permute.xlu1 %1956  ;;  %v4289_v18 = vpop.permute.xlu0 %1954  ;;  %v1976_v49 = vadd.f32 %v1974_v30, %v1946_v63 }
 0x1be   : > { %v1958_v58 = vsel %vm1951_vm5, %v4289_v18, %v4287_v17  ;;  %v1959_v57 = vsel %vm1951_vm5, %v4287_v17, %v4289_v18 }
 0x1bf   : > { %v1990_v33 = vmul.f32 %v1983_v48, %v1958_v58  ;;  %v1991_v8 = vmul.f32 %v1987_v46, %v1959_v57  ;;  %v1975_v46 = vadd.f32 %v1973_v42, %v1945_v52 }
 0x1c1   : > { %v4291_v32 = vpop.permute.xlu1 %1996  ;;  %v4293_v3 = vpop.permute.xlu0 %1994  ;;  %v1992_v37 = vadd.f32 %v1990_v33, %v1975_v46  ;;  %v1993_v5 = vadd.f32 %v1991_v8, %v1976_v49  ;;  %v2639_v8 = vld [vmem:[%s4870_s0 + $0x54] ss:$8 sm:$0x3]  ;;  %v2640_v49 = vld [vmem:[%s4870_s0 + $0xb5] ss:$8 sm:$0x3] }
 0x1c2   : > { %v1999_v17 = vsel %vm1998_vm6, %v4293_v3, %v4291_v32  ;;  %v2000_v18 = vsel %vm1998_vm6, %v4291_v32, %v4293_v3  ;;  %v4613_v32 = vld [vmem:[%s4870_s0 + $0x52] ss:$8 sm:$0x3]  ;;  %v2252_v22 = vrot.slane %v2639_v8, %v3010_v9 }
 0x1c3   : > { %v2020_v27 = vmul.f32 %v2013_v31, %v1999_v17  ;;  %v2021_v50 = vmul.f32 %v2017_v13, %v2000_v18  ;;  %v2154_v31 = vrot.slane %v4613_v32, %v3004_v7  ;;  %v2158_v43 = vrot.slane %v4613_v32, %v3010_v9 }
 0x1c5   : > { %v4295_v40 = vpop.permute.xlu1 %2003  ;;  %v4297_v45 = vpop.permute.xlu0 %2001  ;;  %v2022_v41 = vadd.f32 %v2020_v27, %v1992_v37  ;;  %v2023_v58 = vadd.f32 %v2021_v50, %v1993_v5  ;;  %v2248_v50 = vrot.slane %v2639_v8, %v3004_v7  ;;  %v2269_v5 = vrot.slane %v2640_v49, %v3010_v9 }
 0x1c6   : > { %v2005_v16 = vsel %vm1998_vm6, %v4297_v45, %v4295_v40  ;;  %v2006_v48 = vsel %vm1998_vm6, %v4295_v40, %v4297_v45 }
 0x1c7   : > { %v2037_v1 = vmul.f32 %v2030_v11, %v2005_v16  ;;  %v2038_v0 = vmul.f32 %v2034_v55, %v2006_v48  ;;  %v2175_v55 = vrot.slane %v4637_v51, %v3010_v9 }
 0x1c9   : > { %v4308_v28 = vpop.permute.xlu1 %2043  ;;  %v2040_v42 = vadd.f32 %v2038_v0, %v2023_v58 }
 0x1ca   : > { %v4314_v38 = vpop.permute.xlu0 %2041 }
 0x1cb   : > { %v2046_v40 = vsel %vm2045_vm7, %v4314_v38, %v4308_v28  ;;  %v2047_v45 = vsel %vm2045_vm7, %v4308_v28, %v4314_v38  ;;  %v4662_v28 = vld [vmem:[%s4870_s0 + $0x53] ss:$8 sm:$0x3] }
 0x1cc   : > { %v2067_v57 = vmul.f32 %v2060_v29, %v2046_v40  ;;  %v2068_v4 = vmul.f32 %v2064_v54, %v2047_v45  ;;  %v2201_v26 = vrot.slane %v4662_v28, %v3004_v7  ;;  %v2039_v54 = vadd.f32 %v2037_v1, %v2022_v41  ;;  %v2641_v45 = vld [vmem:[%s4870_s0 + $0x55] ss:$8 sm:$0x3] }
 0x1cd   : > { %v4343_v12 = vpop.permute.xlu1 %2050  ;;  %v2205_v52 = vrot.slane %v4662_v28, %v3010_v9 }
 0x1ce   : > { %v4356_v60 = vpop.permute.xlu0 %2048  ;;  %v2069_v63 = vadd.f32 %v2067_v57, %v2039_v54  ;;  %v2070_v19 = vadd.f32 %v2068_v4, %v2040_v42 }
 0x1cf   : > { %v2052_v36 = vsel %vm2045_vm7, %v4356_v60, %v4343_v12  ;;  %v2053_v11 = vsel %vm2045_vm7, %v4343_v12, %v4356_v60  ;;  %v4687_v12 = vld [vmem:[%s4870_s0 + $0xb4] ss:$8 sm:$0x3] }
 0x1d0   : > { %v2084_v30 = vmul.f32 %v2077_v44, %v2052_v36  ;;  %v2085_v17 = vmul.f32 %v2081_v35, %v2053_v11  ;;  %v2218_v44 = vrot.slane %v4687_v12, %v3004_v7  ;;  %v2642_v36 = vld [vmem:[%s4870_s0 + $0xb6] ss:$8 sm:$0x3] }
 0x1d1   : > { %v4386_v62 = vpop.permute.xlu1 %2090 }
 0x1d2   : > { %v4396_v2 = vpop.permute.xlu0 %2088  ;;  %v2087_v16 = vadd.f32 %v2085_v17, %v2070_v19  ;;  %v2644_v19 = vld [vmem:[%s4870_s0 + $0xb7] ss:$8 sm:$0x3] }
 0x1d3   : > { %v2093_v60 = vsel %vm2092_vm8, %v4396_v2, %v4386_v62  ;;  %v2094_v20 = vsel %vm2092_vm8, %v4386_v62, %v4396_v2 }
 0x1d4   : > { %v2114_v35 = vmul.f32 %v2107_v10, %v2093_v60  ;;  %v2115_v33 = vmul.f32 %v2111_v24, %v2094_v20  ;;  %v2086_v24 = vadd.f32 %v2084_v30, %v2069_v63  ;;  %v2643_v30 = vld [vmem:[%s4870_s0 + $0x56] ss:$8 sm:$0x3] }
 0x1d5   : > { %v4429_v14 = vpop.permute.xlu1 %2097 }
 0x1d6   : > { %v4437_v61 = vpop.permute.xlu0 %2095 }
 0x1d7   : > { %v2099_v62 = vsel %vm2092_vm8, %v4437_v61, %v4429_v14  ;;  %v2100_v2 = vsel %vm2092_vm8, %v4429_v14, %v4437_v61  ;;  %v2222_v61 = vrot.slane %v4687_v12, %v3010_v9 }
 0x1d8   : > { %v2131_v48 = vmul.f32 %v2124_v39, %v2099_v62  ;;  %v2132_v46 = vmul.f32 %v2128_v47, %v2100_v2  ;;  %v2116_v39 = vadd.f32 %v2114_v35, %v2086_v24  ;;  %v2117_v47 = vadd.f32 %v2115_v33, %v2087_v16 }
 0x1d9   : > { %v4468_v34 = vpop.permute.xlu1 %2137 }
 0x1da   : > { %v4476_v23 = vpop.permute.xlu0 %2135  ;;  %v2134_v1 = vadd.f32 %v2132_v46, %v2117_v47 }
 0x1db   : > { %v2140_v32 = vsel %vm2139_vm9, %v4476_v23, %v4468_v34  ;;  %v2141_v14 = vsel %vm2139_vm9, %v4468_v34, %v4476_v23 }
 0x1dc   : > { %v2161_v51 = vmul.f32 %v2154_v31, %v2140_v32  ;;  %v2162_v40 = vmul.f32 %v2158_v43, %v2141_v14  ;;  %v2133_v43 = vadd.f32 %v2131_v48, %v2116_v39  ;;  %v2645_v48 = vld [vmem:[%s4870_s0 + $0x57] ss:$8 sm:$0x3]  ;;  %v2646_v39 = vld [vmem:[%s4870_s0 + $0xc0] ss:$8 sm:$0x3] }
 0x1dd   : > { %v4507_v53 = vpop.permute.xlu1 %2144 }
 0x1de   : > { %v4521_v21 = vpop.permute.xlu0 %2142 }
 0x1df   : > { %v2146_v34 = vsel %vm2139_vm9, %v4521_v21, %v4507_v53  ;;  %v2147_v23 = vsel %vm2139_vm9, %v4507_v53, %v4521_v21  ;;  %v2265_v21 = vrot.slane %v2640_v49, %v3004_v7  ;;  %v2359_v49 = vrot.slane %v2644_v19, %v3004_v7 }
 0x1e0   : > { %v2178_v0 = vmul.f32 %v2171_v56, %v2146_v34  ;;  %v2179_v28 = vmul.f32 %v2175_v55, %v2147_v23  ;;  %v2163_v56 = vadd.f32 %v2161_v51, %v2133_v43  ;;  %v2164_v55 = vadd.f32 %v2162_v40, %v2134_v1 }
 0x1e1   : > { %v4558_v15 = vpop.permute.xlu1 %2184 }
 0x1e2   : > { %v4571_v59 = vpop.permute.xlu0 %2182  ;;  %v2180_v20 = vadd.f32 %v2178_v0, %v2163_v56  ;;  %v2181_v54 = vadd.f32 %v2179_v28, %v2164_v55  ;;  %v2393_v0 = vrot.slane %v2645_v48, %v3010_v9  ;;  %v2406_v28 = vrot.slane %v2646_v39, %v3004_v7 }
 0x1e3   : > { %v2187_v37 = vsel %vm2186_vm10, %v4571_v59, %v4558_v15  ;;  %v2188_v53 = vsel %vm2186_vm10, %v4558_v15, %v4571_v59  ;;  %v2295_v59 = vrot.slane %v2641_v45, %v3004_v7 }
 0x1e4   : > { %v2208_v58 = vmul.f32 %v2201_v26, %v2187_v37  ;;  %v2209_v57 = vmul.f32 %v2205_v52, %v2188_v53 }
 0x1e5   : > { %v4602_v25 = vpop.permute.xlu1 %2191 }
 0x1e6   : > { %v4615_v3 = vpop.permute.xlu0 %2189  ;;  %v2210_v2 = vadd.f32 %v2208_v58, %v2180_v20  ;;  %v2211_v52 = vadd.f32 %v2209_v57, %v2181_v54  ;;  %v2410_v57 = vrot.slane %v2646_v39, %v3010_v9 }
 0x1e7   : > { %v2193_v41 = vsel %vm2186_vm10, %v4615_v3, %v4602_v25  ;;  %v2194_v15 = vsel %vm2186_vm10, %v4602_v25, %v4615_v3  ;;  %v2299_v25 = vrot.slane %v2641_v45, %v3010_v9  ;;  %v2312_v3 = vrot.slane %v2642_v36, %v3004_v7 }
 0x1e8   : > { %v2225_v42 = vmul.f32 %v2218_v44, %v2193_v41  ;;  %v2226_v26 = vmul.f32 %v2222_v61, %v2194_v15  ;;  %v2389_v45 = vrot.slane %v2645_v48, %v3004_v7 }
 0x1e9   : > { %v4651_v13 = vpop.permute.xlu1 %2231 }
 0x1ea   : > { %v4664_v38 = vpop.permute.xlu0 %2229  ;;  %v2227_v32 = vadd.f32 %v2225_v42, %v2210_v2  ;;  %v2228_v14 = vadd.f32 %v2226_v26, %v2211_v52 }
 0x1eb   : > { %v2234_v4 = vsel %vm2233_vm11, %v4664_v38, %v4651_v13  ;;  %v2235_v12 = vsel %vm2233_vm11, %v4651_v13, %v4664_v38  ;;  %v2316_v38 = vrot.slane %v2642_v36, %v3010_v9 }
 0x1ec   : > { %v2255_v44 = vmul.f32 %v2248_v50, %v2234_v4  ;;  %v2256_v63 = vmul.f32 %v2252_v22, %v2235_v12 }
 0x1ed   : > { %v4700_v29 = vpop.permute.xlu1 %2238 }
 0x1ee   : > { %v2237_v18 = vpop.permute.xlu0 %2236  ;;  %v2257_v34 = vadd.f32 %v2255_v44, %v2227_v32  ;;  %v2258_v23 = vadd.f32 %v2256_v63, %v2228_v14 }
 0x1ef   : > { %v2240_v62 = vsel %vm2233_vm11, %v2237_v18, %v4700_v29  ;;  %v2241_v13 = vsel %vm2233_vm11, %v4700_v29, %v2237_v18  ;;  %v2342_v29 = vrot.slane %v2643_v30, %v3004_v7  ;;  %v2346_v18 = vrot.slane %v2643_v30, %v3010_v9 }
 0x1f0   : > { %v2272_v61 = vmul.f32 %v2265_v21, %v2240_v62  ;;  %v2273_v24 = vmul.f32 %v2269_v5, %v2241_v13 }
 0x1f1   : > { %v2279_v10 = vpop.permute.xlu1 %2278 }
 0x1f2   : > { %v2277_v27 = vpop.permute.xlu0 %2276  ;;  %v2274_v37 = vadd.f32 %v2272_v61, %v2257_v34  ;;  %v2275_v53 = vadd.f32 %v2273_v24, %v2258_v23 }
 0x1f3   : > { %v2281_v35 = vsel %vm2280_vm12, %v2277_v27, %v2279_v10  ;;  %v2282_v33 = vsel %vm2280_vm12, %v2279_v10, %v2277_v27  ;;  %v2363_v27 = vrot.slane %v2644_v19, %v3010_v9 }
 0x1f4   : > { %v2302_v50 = vmul.f32 %v2295_v59, %v2281_v35  ;;  %v2303_v22 = vmul.f32 %v2299_v25, %v2282_v33  ;;  %v2647_v59 = vld [vmem:[%s4870_s0 + $0x60] ss:$8 sm:$0x3] }
 0x1f5   : > { %v2286_v31 = vpop.permute.xlu1 %2285  ;;  %v2436_v42 = vrot.slane %v2647_v59, %v3004_v7  ;;  %v2440_v26 = vrot.slane %v2647_v59, %v3010_v9 }
 0x1f6   : > { %v2284_v11 = vpop.permute.xlu0 %2283  ;;  %v2304_v36 = vadd.f32 %v2302_v50, %v2274_v37 }
 0x1f7   : > { %v2287_v46 = vsel %vm2280_vm12, %v2284_v11, %v2286_v31  ;;  %v2288_v10 = vsel %vm2280_vm12, %v2286_v31, %v2284_v11  ;;  %v2305_v11 = vadd.f32 %v2303_v22, %v2275_v53 }
 0x1f8   : > { %v2319_v21 = vmul.f32 %v2312_v3, %v2287_v46  ;;  %v2320_v5 = vmul.f32 %v2316_v38, %v2288_v10  ;;  %v2648_v38 = vld [vmem:[%s4870_s0 + $0xc1] ss:$8 sm:$0x3] }
 0x1f9   : > { %v2326_v60 = vpop.permute.xlu1 %2325 }
 0x1fa   : > { %v2324_v17 = vpop.permute.xlu0 %2323  ;;  %v2321_v4 = vadd.f32 %v2319_v21, %v2304_v36  ;;  %v2322_v12 = vadd.f32 %v2320_v5, %v2305_v11 }
 0x1fb   : > { %v2328_v47 = vsel %vm2327_vm13, %v2324_v17, %v2326_v60  ;;  %v2329_v51 = vsel %vm2327_vm13, %v2326_v60, %v2324_v17 }
 0x1fc   : > { %v2349_v41 = vmul.f32 %v2342_v29, %v2328_v47  ;;  %v2350_v15 = vmul.f32 %v2346_v18, %v2329_v51  ;;  %v2453_v18 = vrot.slane %v2648_v38, %v3004_v7 }
 0x1fd   : > { %v2333_v8 = vpop.permute.xlu1 %2332 }
 0x1fe   : > { %v2331_v16 = vpop.permute.xlu0 %2330  ;;  %v2351_v30 = vadd.f32 %v2349_v41, %v2321_v4  ;;  %v2352_v17 = vadd.f32 %v2350_v15, %v2322_v12 }
 0x1ff   : > { %v2334_v43 = vsel %vm2327_vm13, %v2331_v16, %v2333_v8  ;;  %v2335_v1 = vsel %vm2327_vm13, %v2333_v8, %v2331_v16  ;;  %v2457_v8 = vrot.slane %v2648_v38, %v3010_v9 }
 0x200   : > { %v2366_v25 = vmul.f32 %v2359_v49, %v2334_v43  ;;  %v2367_v3 = vmul.f32 %v2363_v27, %v2335_v1  ;;  %v2719_v43 = vld [vmem:[%s2808_s14] sm:$0xff] }
 0x201   : > { %v2373_v40 = vpop.permute.xlu1 %2372 }
 0x202   : > { %v2371_v31 = vpop.permute.xlu0 %2370  ;;  %v2368_v52 = vadd.f32 %v2366_v25, %v2351_v30  ;;  %v2369_v44 = vadd.f32 %v2367_v3, %v2352_v17 }
 0x203   : > { %v2375_v56 = vsel %vm2374_vm14, %v2371_v31, %v2373_v40  ;;  %v2376_v55 = vsel %vm2374_vm14, %v2373_v40, %v2371_v31 }
 0x204   : > { %v2396_v62 = vmul.f32 %v2389_v45, %v2375_v56  ;;  %v2397_v13 = vmul.f32 %v2393_v0, %v2376_v55  ;;  %v2720_v0 = vld [vmem:[%s2808_s14 + $0x8] sm:$0xff] }
 0x205   : > { %v2380_v58 = vpop.permute.xlu1 %2379 }
 0x206   : > { %v2378_v60 = vpop.permute.xlu0 %2377  ;;  %v2398_v32 = vadd.f32 %v2396_v62, %v2368_v52  ;;  %v2399_v14 = vadd.f32 %v2397_v13, %v2369_v44 }
 0x207   : > { %v2381_v20 = vsel %vm2374_vm14, %v2378_v60, %v2380_v58  ;;  %v2382_v54 = vsel %vm2374_vm14, %v2380_v58, %v2378_v60 }
 0x208   : > { %v2413_v63 = vmul.f32 %v2406_v28, %v2381_v20  ;;  %v2414_v19 = vmul.f32 %v2410_v57, %v2382_v54 }
 0x209   : > { %v2420_v2 = vpop.permute.xlu1 %2419 }
 0x20a   : > { %v2418_v35 = vpop.permute.xlu0 %2417  ;;  %v2415_v48 = vadd.f32 %v2413_v63, %v2398_v32  ;;  %v2416_v46 = vadd.f32 %v2414_v19, %v2399_v14 }
 0x20b   : > { %v2422_v33 = vsel %vm2421_vm15, %v2418_v35, %v2420_v2  ;;  %v2423_v29 = vsel %vm2421_vm15, %v2420_v2, %v2418_v35 }
 0x20c   : > { %v2443_v61 = vmul.f32 %v2436_v42, %v2422_v33  ;;  %v2444_v24 = vmul.f32 %v2440_v26, %v2423_v29 }
 0x20d   : > { %v2427_v16 = vpop.permute.xlu1 %2426 }
 0x20e   : > { %v2425_v10 = vpop.permute.xlu0 %2424  ;;  %v2445_v34 = vadd.f32 %v2443_v61, %v2415_v48  ;;  %v2446_v23 = vadd.f32 %v2444_v24, %v2416_v46 }
 0x20f   : > { %v2428_v49 = vsel %vm2421_vm15, %v2425_v10, %v2427_v16  ;;  %v2429_v27 = vsel %vm2421_vm15, %v2427_v16, %v2425_v10 }
 0x210   : > { %v2460_v50 = vmul.f32 %v2453_v18, %v2428_v49  ;;  %v2461_v22 = vmul.f32 %v2457_v8, %v2429_v27 }
 0x212   : > { %v2462_v9 = vadd.f32 %v2460_v50, %v2445_v34  ;;  %v2463_v39 = vadd.f32 %v2461_v22, %v2446_v23 }
 0x214   : > { %v2649_v47 = vmul.f32 -1.442695, %v2462_v9  ;;  %v2650_v51 = vmul.f32 -1.442695, %v2463_v39 }
 0x216   : > { %2711 = vpow2.f32 %v2649_v47 }
 0x217   : > { %2713 = vpow2.f32 %v2650_v51 }
 0x220   : > { %v2712_v40 = vpop.eup %2711 }
 0x221   : > { %v2714_v45 = vpop.eup %2713  ;;  %v2470_v37 = vadd.f32 1.0, %v2712_v40 }
 0x222   : > { %v2471_v53 = vadd.f32 1.0, %v2714_v45 }
 0x223   : > { %2715 = vrcp.f32 %v2470_v37 }
 0x224   : > { %2717 = vrcp.f32 %v2471_v53 }
 0x22d   : > { %v2716_v6 = vpop.eup %2715 }
 0x22e   : > { %v2718_v21 = vpop.eup %2717  ;;  %v2479_v5 = vrot.slane %v2716_v6, %v3004_v7 }
 0x22f   : > { %v2483_v31 = vrot.slane %v2718_v21, %v3004_v7 }
 0x230   : > { %v2484_v1 = vmul.f32 %v2719_v43, %v2479_v5 }
 0x231   : > { %v2485_v28 = vmul.f32 %v2720_v0, %v2483_v31 }
 0x232   : > { %2486 = vst [vmem:[%s143_s21] sm:$0xff] %v2484_v1 }
 0x233   : > { %2487 = vst [vmem:[%s143_s21 + $0x8] sm:$0xff] %v2485_v28 }
 0x234 PF: > { %s12_s9 = sadd.s32 1, %s2727_s9  }
 0x235   : > { %p9_p4 = scmp.ge.s32.totalorder %s12_s9, 4  }
 0x237   :  { %11 = sbr.rel (!%p9_p4) target bundleno = 1 (0x1), region = 155 }

</bundles_post_ra>
